<compile_context>
chip_gen: v7x
topology: tpu7x:2x2x1
jax: 0.10.0
libtpu: 0.0.40
codegen_flags: <defaults>
</compile_context>

<pallas_src>
import functools

import jax
import jax.numpy as jnp
from jax.experimental import pallas as pl
from jax.experimental.pallas import tpu as pltpu


def _round_up(x, m):
    return ((x + m - 1) // m) * m


def _pick_row_tile(h, w, target_rows=1024):
    """Output-row tile th with th*w <= target_rows.

    Prefers a divisor of h (no padded tail rows); falls back to the largest
    sublane-aligned (th*w % 8 == 0) tile if divisors are much smaller, so
    awkward H never degrades to th=1.
    """
    cap = max(1, min(h, target_rows // max(w, 1)))
    best_div = 1
    for cand in range(1, cap + 1):
        if h % cand == 0:
            best_div = cand
    best_any = cap
    for cand in range(cap, 0, -1):
        if (cand * w) % 8 == 0:
            best_any = cand
            break
    if best_div * 2 >= best_any:
        return best_div
    return best_any


# ----------------------------------------------------------------------------
# Fused conv3x3(s1, p1) + BatchNorm(running stats) + ReLU kernel
# ----------------------------------------------------------------------------
def _conv3x3_bn_relu_kernel(x_ref, w_ref, scale_ref, bias_ref, o_ref, *,
                            th, out_w):
    # x_ref:     (1, Hp, Wp, Cin_p)  bf16  padded image (resident per batch n)
    # w_ref:     (9*Cin_p, tn)       bf16  one OC tile of folded tap weights
    # scale_ref: (1, tn)             f32   gamma / sqrt(var + eps)
    # bias_ref:  (1, tn)             f32   beta + (conv_bias - mean) * scale
    # o_ref:     (1, th, out_w, tn)  out dtype
    hb = pl.program_id(2)
    row0 = pl.multiple_of(hb * th, th)
    cin_p = x_ref.shape[-1]

    # Gather the 9 taps as channel-concatenated slices of the padded image, so
    # the whole 3x3 conv becomes a single
    #   (th*out_w, 9*Cin_p) @ (9*Cin_p, tn)
    # matmul instead of nine tiny-K matmuls through a VMEM accumulator.
    taps = []
    for dy in range(3):
        rows = x_ref[0, pl.ds(row0 + dy, th), :, :]        # (th, Wp, Cin_p)
        for dx in range(3):
            taps.append(rows[:, dx:dx + out_w, :])         # static W-shift
    lhs = jnp.concatenate(taps, axis=-1)                   # (th, out_w, 9*Cin_p)
    lhs = lhs.reshape(th * out_w, 9 * cin_p)

    y = jnp.dot(lhs, w_ref[...], preferred_element_type=jnp.float32)
    y = y * scale_ref[...] + bias_ref[...]                 # fused BatchNorm
    y = jnp.maximum(y, 0.0)                                # fused ReLU
    o_ref[...] = y.reshape(o_ref.shape).astype(o_ref.dtype)


# ----------------------------------------------------------------------------
# Wrapper: layout plumbing (NCHW<->NHWC, padding, BN folding); compute is in
# the Pallas kernel.
# ----------------------------------------------------------------------------
def basic_conv2d_311_forward(x_nchw, params, *, eps=1e-3,
                             compute_dtype=jnp.bfloat16,
                             out_dtype=jnp.float32,
                             out_layout="NCHW",
                             target_rows=1024):
    """conv3x3(s1, p1) + BatchNorm2d(eps, running stats) + ReLU.

    NCHW input. out_layout="NHWC" (+ out_dtype=bf16) skips the output
    transpose post-pass and halves output HBM writeback when the consumer
    can take NHWC/bf16 directly.
    """
    w, b = params["w"], params["b"]
    gamma, beta, mean, var = (params["gamma"], params["beta"],
                              params["mean"], params["var"])

    n, cin, h, wdt = x_nchw.shape
    oc = w.shape[0]

    # Fold BN (running stats) + conv bias into a per-channel scale / shift.
    scale = gamma * jax.lax.rsqrt(var + eps)
    bias = beta + (b - mean) * scale

    cin_p = _round_up(cin, 16)                   # bf16 sublane packing
    oc_p = _round_up(oc, 128)                    # lane-dense output channels
    tn = 256 if oc_p % 256 == 0 else 128         # fill 256-deep MXU when possible
    th = _pick_row_tile(h, wdt, target_rows)     # output-row tile
    n_ht = (h + th - 1) // th
    h_pad = n_ht * th                            # full blocks along H

    # Activations: NCHW -> NHWC, zero halo + row-tile padding, bf16 operands.
    # (One fused XLA copy; accept NHWC/bf16 activations upstream to skip it.)
    x_nhwc = jnp.transpose(x_nchw, (0, 2, 3, 1))
    x_pad = jnp.pad(x_nhwc, ((0, 0), (1, h_pad + 1 - h), (1, 1),
                             (0, cin_p - cin)))
    x_pad = x_pad.astype(compute_dtype)
    hp, wp = h_pad + 2, wdt + 2

    # Weights: PyTorch (OC, Cin, 3, 3) -> (3, 3, Cin_p, OC_p) -> folded
    # (9*Cin_p, OC_p) so the 9 taps contract in a single matmul.
    w_hwio = jnp.transpose(w, (2, 3, 1, 0))
    w_hwio = jnp.pad(w_hwio, ((0, 0), (0, 0), (0, cin_p - cin), (0, oc_p - oc)))
    w_folded = w_hwio.reshape(9 * cin_p, oc_p).astype(compute_dtype)

    scale_p = jnp.pad(scale, (0, oc_p - oc)).reshape(1, oc_p).astype(jnp.float32)
    bias_p = jnp.pad(bias, (0, oc_p - oc)).reshape(1, oc_p).astype(jnp.float32)

    # VMEM budget. Single-buffer the per-image input block when it is large:
    # its block index only changes on the outermost batch axis, so Buffered(1)
    # halves input VMEM at the cost of one exposed DMA per image (v7x: 64 MiB).
    cdt_bytes = jnp.dtype(compute_dtype).itemsize
    out_bytes = jnp.dtype(out_dtype).itemsize
    x_block_bytes = hp * wp * cin_p * cdt_bytes
    big_input = x_block_bytes > (8 << 20)
    x_spec_kwargs = {"pipeline_mode": pl.Buffered(1)} if big_input else {}
    x_spec = pl.BlockSpec((1, hp, wp, cin_p),
                          lambda nb, j, hb: (nb, 0, 0, 0), **x_spec_kwargs)

    vmem_est = ((1 if big_input else 2) * x_block_bytes
                + 2 * 9 * cin_p * tn * cdt_bytes
                + 2 * th * wdt * tn * out_bytes
                + th * wdt * (9 * cin_p * cdt_bytes + tn * 4)
                + (4 << 20))
    vmem_limit = max(32 << 20, min(int(1.3 * vmem_est), 96 << 20))

    kernel = functools.partial(_conv3x3_bn_relu_kernel, th=th, out_w=wdt)
    grid = (n, oc_p // tn, n_ht)

    out_padded = pl.pallas_call(
        kernel,
        out_shape=jax.ShapeDtypeStruct((n, h_pad, wdt, oc_p), out_dtype),
        grid_spec=pltpu.PrefetchScalarGridSpec(
            num_scalar_prefetch=0,
            grid=grid,
            in_specs=[
                # Full padded image per batch element: block index depends only
                # on nb, so it is DMAed once per image and stays VMEM-resident
                # across the OC-tile and row-tile axes.
                x_spec,
                # Folded tap weights for one OC tile: resident across the
                # row-tile sweep.
                pl.BlockSpec((9 * cin_p, tn), lambda nb, j, hb: (0, j)),
                pl.BlockSpec((1, tn), lambda nb, j, hb: (0, j)),
                pl.BlockSpec((1, tn), lambda nb, j, hb: (0, j)),
            ],
            out_specs=pl.BlockSpec((1, th, wdt, tn),
                                   lambda nb, j, hb: (nb, hb, 0, j)),
        ),
        compiler_params=pltpu.CompilerParams(
            dimension_semantics=("parallel", "parallel", "arbitrary"),
            vmem_limit_bytes=vmem_limit,
        ),
        cost_estimate=pl.CostEstimate(
            flops=2 * n * h_pad * wdt * 9 * cin_p * oc_p,
            transcendentals=0,
            bytes_accessed=(x_pad.size * cdt_bytes + w_folded.size * cdt_bytes
                            + n * h_pad * wdt * oc_p * out_bytes),
        ),
    )(x_pad, w_folded, scale_p, bias_p)

    out = out_padded
    if h_pad != h:
        out = out[:, :h]                        # drop row-tile tail padding
    if oc_p != oc:
        out = out[..., :oc]                     # drop lane padding
    if out_layout == "NHWC":
        return out
    # Layout plumbing for PyTorch NCHW parity; fold into the consumer when
    # possible (use out_layout="NHWC") to avoid this extra HBM pass.
    return jnp.transpose(out, (0, 3, 1, 2))


# ----------------------------------------------------------------------------
# Pure-XLA reference (for validation only; not part of the kernel path)
# ----------------------------------------------------------------------------
def _reference_forward(x_nchw, params, *, eps=1e-3,
                       operand_dtype=jnp.float32):
    x = x_nchw.astype(operand_dtype).astype(jnp.float32)
    w = params["w"].astype(operand_dtype).astype(jnp.float32)
    y = jax.lax.conv_general_dilated(
        x, w, window_strides=(1, 1), padding=((1, 1), (1, 1)),
        dimension_numbers=("NCHW", "OIHW", "NCHW"),
        precision=jax.lax.Precision.HIGHEST)
    y = y + params["b"][None, :, None, None]
    scale = params["gamma"] * jax.lax.rsqrt(params["var"] + eps)
    shift = params["beta"] - params["mean"] * scale
    y = y * scale[None, :, None, None] + shift[None, :, None, None]
    return jnp.maximum(y, 0.0)


# ----------------------------------------------------------------------------
# Deterministic parameter construction
# ----------------------------------------------------------------------------
def init_params(key, in_channels, out_channels):
    k_w, k_b = jax.random.split(key)
    fan_in = in_channels * 9
    w = jax.random.normal(k_w, (out_channels, in_channels, 3, 3),
                          jnp.float32) / jnp.sqrt(fan_in)
    b = jax.random.normal(k_b, (out_channels,), jnp.float32) * 0.01
    return {
        "w": w, "b": b,
        "gamma": jnp.ones((out_channels,), jnp.float32),
        "beta": jnp.zeros((out_channels,), jnp.float32),
        "mean": jnp.zeros((out_channels,), jnp.float32),
        "var": jnp.ones((out_channels,), jnp.float32),
    }


if __name__ == "__main__":
    key = jax.random.PRNGKey(0)
    k_p, k_x, k_p2, k_x2 = jax.random.split(key, 4)

    batch, in_channels, height, width = 2, 4, 16, 16
    out_channels = 32

    x = jax.random.normal(k_x, (batch, in_channels, height, width), jnp.float32)
    params = init_params(k_p, in_channels, out_channels)

    # PyTorch-parity path (NCHW in/out, f32 output).
    fwd = jax.jit(basic_conv2d_311_forward)
    out = jax.block_until_ready(fwd(x, params))
    assert out.shape == (batch, out_channels, height, width), out.shape
    assert bool(jnp.all(jnp.isfinite(out)))

    # Validate against a pure-XLA reference computed on the same bf16-rounded
    # operands (so only accumulation order differs).
    ref = _reference_forward(x, params, operand_dtype=jnp.bfloat16)
    max_err = float(jnp.max(jnp.abs(out - ref)))
    assert max_err < 1e-2, f"max abs error {max_err}"

    # Optimized output path: NHWC layout + bf16 writeback (no post-transpose,
    # half the output HBM traffic).
    fwd_fast = jax.jit(functools.partial(basic_conv2d_311_forward,
                                         out_dtype=jnp.bfloat16,
                                         out_layout="NHWC"))
    out_fast = jax.block_until_ready(fwd_fast(x, params))
    assert out_fast.shape == (batch, height, width, out_channels)
    ref_nhwc = jnp.transpose(ref, (0, 2, 3, 1))
    fast_err = float(jnp.max(jnp.abs(out_fast.astype(jnp.float32) - ref_nhwc)))
    assert fast_err < 5e-2, f"max abs error (bf16/NHWC path) {fast_err}"

    # Awkward shapes: non-128 OC, non-16 Cin, H that does not divide the row
    # tile (exercises channel padding + row-tile tail handling).
    x2 = jax.random.normal(k_x2, (1, 3, 22, 24), jnp.float32)
    params2 = init_params(k_p2, 3, 40)
    fwd2 = jax.jit(functools.partial(basic_conv2d_311_forward, target_rows=128))
    out2 = jax.block_until_ready(fwd2(x2, params2))
    assert out2.shape == (1, 40, 22, 24), out2.shape
    ref2 = _reference_forward(x2, params2, operand_dtype=jnp.bfloat16)
    err2 = float(jnp.max(jnp.abs(out2 - ref2)))
    assert err2 < 1e-2, f"max abs error (awkward shapes) {err2}"

    print("KERNEL_OK")
</pallas_src>

<mosaic_0001>
module attributes {stable_mosaic.version = 11 : i64} {
  func.func @_conv3x3_bn_relu_kernel(%arg0: i32, %arg1: i32, %arg2: i32, %arg3: memref<1x18x18x16xbf16, #tpu.memory_space<vmem>>, %arg4: memref<144x128xbf16, #tpu.memory_space<vmem>>, %arg5: memref<1x128xf32, #tpu.memory_space<vmem>>, %arg6: memref<1x128xf32, #tpu.memory_space<vmem>>, %arg7: memref<1x16x16x128xf32, #tpu.memory_space<vmem>>) attributes {dimension_semantics = [#tpu.dimension_semantics<parallel>, #tpu.dimension_semantics<parallel>, #tpu.dimension_semantics<arbitrary>], iteration_bounds = array<i64: 2, 1, 1>, scalar_prefetch = 0 : i64, scratch_operands = 0 : i64, tpu.core_type = #tpu.core_type<tc>, window_params = [{transform_indices = @transform_0, window_bounds = array<i64: 1, 18, 18, 16>}, {transform_indices = @transform_1, window_bounds = array<i64: 144, 128>}, {transform_indices = @transform_2, window_bounds = array<i64: 1, 128>}, {transform_indices = @transform_3, window_bounds = array<i64: 1, 128>}, {transform_indices = @transform_4, window_bounds = array<i64: 1, 16, 16, 128>}]} {
    %c16_i32 = arith.constant 16 : i32
    %0 = arith.muli %arg2, %c16_i32 : i32
    %1 = tpu.assume_multiple %0, 16 : i32
    %c0_i32 = arith.constant 0 : i32
    %2 = arith.addi %1, %c0_i32 : i32
    %c0 = arith.constant 0 : index
    %3 = arith.index_cast %2 : i32 to index
    %c0_0 = arith.constant 0 : index
    %c0_1 = arith.constant 0 : index
    %4 = vector.load %arg3[%c0, %3, %c0_0, %c0_1] : memref<1x18x18x16xbf16, #tpu.memory_space<vmem>>, vector<1x16x18x16xbf16>
    %5 = vector.shape_cast %4 : vector<1x16x18x16xbf16> to vector<16x18x16xbf16>
    %6 = vector.extract_strided_slice %5 {offsets = [0, 0, 0], sizes = [16, 16, 16], strides = [1, 1, 1]} : vector<16x18x16xbf16> to vector<16x16x16xbf16>
    %7 = vector.extract_strided_slice %5 {offsets = [0, 1, 0], sizes = [16, 16, 16], strides = [1, 1, 1]} : vector<16x18x16xbf16> to vector<16x16x16xbf16>
    %8 = vector.extract_strided_slice %5 {offsets = [0, 2, 0], sizes = [16, 16, 16], strides = [1, 1, 1]} : vector<16x18x16xbf16> to vector<16x16x16xbf16>
    %c1_i32 = arith.constant 1 : i32
    %9 = arith.addi %1, %c1_i32 : i32
    %c0_2 = arith.constant 0 : index
    %10 = arith.index_cast %9 : i32 to index
    %c0_3 = arith.constant 0 : index
    %c0_4 = arith.constant 0 : index
    %11 = vector.load %arg3[%c0_2, %10, %c0_3, %c0_4] : memref<1x18x18x16xbf16, #tpu.memory_space<vmem>>, vector<1x16x18x16xbf16>
    %12 = vector.shape_cast %11 : vector<1x16x18x16xbf16> to vector<16x18x16xbf16>
    %13 = vector.extract_strided_slice %12 {offsets = [0, 0, 0], sizes = [16, 16, 16], strides = [1, 1, 1]} : vector<16x18x16xbf16> to vector<16x16x16xbf16>
    %14 = vector.extract_strided_slice %12 {offsets = [0, 1, 0], sizes = [16, 16, 16], strides = [1, 1, 1]} : vector<16x18x16xbf16> to vector<16x16x16xbf16>
    %15 = vector.extract_strided_slice %12 {offsets = [0, 2, 0], sizes = [16, 16, 16], strides = [1, 1, 1]} : vector<16x18x16xbf16> to vector<16x16x16xbf16>
    %c2_i32 = arith.constant 2 : i32
    %16 = arith.addi %1, %c2_i32 : i32
    %c0_5 = arith.constant 0 : index
    %17 = arith.index_cast %16 : i32 to index
    %c0_6 = arith.constant 0 : index
    %c0_7 = arith.constant 0 : index
    %18 = vector.load %arg3[%c0_5, %17, %c0_6, %c0_7] : memref<1x18x18x16xbf16, #tpu.memory_space<vmem>>, vector<1x16x18x16xbf16>
    %19 = vector.shape_cast %18 : vector<1x16x18x16xbf16> to vector<16x18x16xbf16>
    %20 = vector.extract_strided_slice %19 {offsets = [0, 0, 0], sizes = [16, 16, 16], strides = [1, 1, 1]} : vector<16x18x16xbf16> to vector<16x16x16xbf16>
    %21 = vector.extract_strided_slice %19 {offsets = [0, 1, 0], sizes = [16, 16, 16], strides = [1, 1, 1]} : vector<16x18x16xbf16> to vector<16x16x16xbf16>
    %22 = vector.extract_strided_slice %19 {offsets = [0, 2, 0], sizes = [16, 16, 16], strides = [1, 1, 1]} : vector<16x18x16xbf16> to vector<16x16x16xbf16>
    %23 = tpu.concatenate %6, %7, %8, %13, %14, %15, %20, %21, %22 in 2 : vector<16x16x16xbf16>, vector<16x16x16xbf16>, vector<16x16x16xbf16>, vector<16x16x16xbf16>, vector<16x16x16xbf16>, vector<16x16x16xbf16>, vector<16x16x16xbf16>, vector<16x16x16xbf16>, vector<16x16x16xbf16> -> vector<16x16x144xbf16>
    %24 = vector.shape_cast %23 : vector<16x16x144xbf16> to vector<256x144xbf16>
    %c0_8 = arith.constant 0 : index
    %c0_9 = arith.constant 0 : index
    %25 = vector.load %arg4[%c0_8, %c0_9] : memref<144x128xbf16, #tpu.memory_space<vmem>>, vector<144x128xbf16>
    %cst = arith.constant dense<0.000000e+00> : vector<256x128xf32>
    %26 = tpu.matmul %24, %25, %cst {dimension_numbers = #tpu.dot_dimension_numbers<[1], [0], [0], [1], [0, 0, 1, 1], [], []>} : vector<256x144xbf16>, vector<144x128xbf16>, vector<256x128xf32> -> vector<256x128xf32>
    %c0_10 = arith.constant 0 : index
    %c0_11 = arith.constant 0 : index
    %27 = vector.load %arg5[%c0_10, %c0_11] : memref<1x128xf32, #tpu.memory_space<vmem>>, vector<1x128xf32>
    %28 = vector.broadcast %27 : vector<1x128xf32> to vector<256x128xf32>
    %29 = arith.mulf %26, %28 : vector<256x128xf32>
    %c0_12 = arith.constant 0 : index
    %c0_13 = arith.constant 0 : index
    %30 = vector.load %arg6[%c0_12, %c0_13] : memref<1x128xf32, #tpu.memory_space<vmem>>, vector<1x128xf32>
    %31 = vector.broadcast %30 : vector<1x128xf32> to vector<256x128xf32>
    %32 = arith.addf %29, %31 : vector<256x128xf32>
    %cst_14 = arith.constant 0.000000e+00 : f32
    %33 = vector.broadcast %cst_14 : f32 to vector<256x128xf32>
    %34 = arith.maximumf %32, %33 : vector<256x128xf32>
    %35 = vector.shape_cast %34 : vector<256x128xf32> to vector<1x16x16x128xf32>
    %c0_15 = arith.constant 0 : index
    %c0_16 = arith.constant 0 : index
    %c0_17 = arith.constant 0 : index
    %c0_18 = arith.constant 0 : index
    %36 = vector.load %arg7[%c0_15, %c0_16, %c0_17, %c0_18] : memref<1x16x16x128xf32, #tpu.memory_space<vmem>>, vector<1x16x16x128xf32>
    tpu.vector_store %arg7[%c0_15, %c0_16, %c0_17, %c0_18], %35 {strides = array<i32>} : memref<1x16x16x128xf32, #tpu.memory_space<vmem>>, vector<1x16x16x128xf32>,
    return
  }
  func.func @transform_0(%arg0: i32, %arg1: i32, %arg2: i32) -> (i32, i32, i32, i32) {
    %c0_i32 = arith.constant 0 : i32
    %c0_i32_0 = arith.constant 0 : i32
    %c0_i32_1 = arith.constant 0 : i32
    %c0_i32_2 = arith.constant 0 : i32
    return %arg0, %c0_i32, %c0_i32_0, %c0_i32_1 : i32, i32, i32, i32
  }
  func.func @transform_1(%arg0: i32, %arg1: i32, %arg2: i32) -> (i32, i32) {
    %c0_i32 = arith.constant 0 : i32
    %c0_i32_0 = arith.constant 0 : i32
    return %c0_i32, %arg1 : i32, i32
  }
  func.func @transform_2(%arg0: i32, %arg1: i32, %arg2: i32) -> (i32, i32) {
    %c0_i32 = arith.constant 0 : i32
    %c0_i32_0 = arith.constant 0 : i32
    return %c0_i32, %arg1 : i32, i32
  }
  func.func @transform_3(%arg0: i32, %arg1: i32, %arg2: i32) -> (i32, i32) {
    %c0_i32 = arith.constant 0 : i32
    %c0_i32_0 = arith.constant 0 : i32
    return %c0_i32, %arg1 : i32, i32
  }
  func.func @transform_4(%arg0: i32, %arg1: i32, %arg2: i32) -> (i32, i32, i32, i32) {
    %c0_i32 = arith.constant 0 : i32
    %c0_i32_0 = arith.constant 0 : i32
    return %arg0, %arg2, %c0_i32, %arg1 : i32, i32, i32, i32
  }
}

</mosaic_0001>

<bundles_post_ra>
// kernel: basic_conv2d_311_forward.1
= control target key start
LH: loop header
LB: loop body
LE: loop exit
PB: predicated region body
PF: predicated region fallthrough
CT: control target
= control target key end

     0   :  { %s3045_s15 = smov 0   ;;  %s3047_s16 = smov 0   ;;  %s4064_s0 = inlined_call_operand.vmem [shape: bf16[2,18,18,16], index: 0, kind: input, shape index: {}]   ;;  %s4065_s1 = inlined_call_operand.vmem [shape: bf16[144,128], index: 1, kind: input, shape index: {}]   ;;  %s4066_s2 = inlined_call_operand.vmem [shape: f32[1,128], index: 2, kind: input, shape index: {}]   ;;  %s4067_s3 = inlined_call_operand.vmem [shape: f32[1,128], index: 3, kind: input, shape index: {}]   ;;  %s4068_s4 = inlined_call_operand.vmem [shape: f32[2,16,16,128], index: 4, kind: output, shape index: {}]  }
   0x1   :  { %s3049_s17 = smov 0  }
   0x2 LB: > { %s33_s18 = sadd.s32 1, %s3006_s16  ;;  %p2596_p0 = scmp.ge.s32.totalorder %s3010_s17, 1  ;;  %s3010_s17 = sphi %s3049_s17, %s14_s17   ;;  %s3006_s16 = sphi %s3047_s16, %s4070_s16   ;;  %s3002_s15 = sphi %s3045_s15, %s4069_s15  }
   0x3   : > { %p35_p1 = scmp.ge.s32.totalorder %s33_s18, 2  ;;  %p210_p2 = scmp.lt.s32.totalorder %s3010_s17, 3 }
   0x5   : > { %s4072_s18 = smov (%p35_p1, %s33_s18), 0  ;;  %p211_p3 = pnand %p2596_p0, %p210_p2 }
   0x6   : > { %p254_p4 = scmp.lt.s32.totalorder (!%p211_p3), %s3002_s15, 1  ;;  %v3012_v0 = vmov (!%p211_p3), 0   ;;  %v2919_v1 = vld [vmem:[%s4065_s1] sm:$0xff] (!%p211_p3)   ;;  %v2922_v2 = vld [vmem:[%s4065_s1 + $0x8] sm:$0xff] (!%p211_p3)   ;;  %vm793_vm0 = vcmask (!%p211_p3), 1046528   ;;  %v2927_v3 = vld [vmem:[%s4065_s1 + $0x10] sm:$0xff] (!%p211_p3)  }
   0x7   : > { %214 = sbr.rel (%p211_p3) target bundleno = 577 (0x241), region = 36  ;;  %2137 = vmatprep.subr.bf16.mxu0 (!%p211_p3), %v3012_v0  ;;  %2822 = vmatprep.subr.bf16.mxu1 (!%p211_p3), %v3012_v0  ;;  %s3013_s29 = smov (!%p211_p3), 48   ;;  %vm568_vm1 = vsmask.f32 (!%p211_p3), 7424  ;;  %v2928_v10 = vld [vmem:[%s4065_s1 + $0x18] sm:$0xff] (!%p211_p3)   ;;  %v2931_v22 = vld [vmem:[%s4065_s1 + $0x20] sm:$0xff] (!%p211_p3)  }
   0x8   : > { %2138 = vmatpush1.bf16.msra.mxu0 (!%p211_p3), %v2919_v1  ;;  %2831 = vmatpush1.bf16.msra.mxu1 (!%p211_p3), %v2919_v1  ;;  %s3014_s6 = smov (!%p211_p3), 80   ;;  %s3015_s9 = smov (!%p211_p3), 32   ;;  %vm1770_vm2 = vcmask (!%p211_p3), 130048   ;;  %vm1803_vm3 = vcmask (!%p211_p3), 261120   ;;  %vm1836_vm4 = vcmask (!%p211_p3), 392192   ;;  %vm1869_vm5 = vcmask (!%p211_p3), 523264  }
   0x9   : > { %2139 = vmatprep.subr.bf16.mxu0 (!%p211_p3), %v3012_v0  ;;  %2823 = vmatprep.subr.bf16.mxu1 (!%p211_p3), %v3012_v0  ;;  %s3016_s10 = smov (!%p211_p3), 16   ;;  %s3017_s11 = smov (!%p211_p3), 64   ;;  %vm1902_vm6 = vcmask (!%p211_p3), 654336   ;;  %vm1935_vm7 = vcmask (!%p211_p3), 785408   ;;  %vm1968_vm8 = vcmask (!%p211_p3), 916480  }
   0xa   : > { %s3018_s12 = smov (!%p211_p3), 96   ;;  %s3019_s13 = smov (!%p211_p3), 112  }
   0xc   : > { %2140 = vmatpush1.bf16.msra.mxu0 (!%p211_p3), %v2922_v2  ;;  %2832 = vmatpush1.bf16.msra.mxu1 (!%p211_p3), %v2922_v2 }
   0xd   : > { %2141 = vmatprep.subr.bf16.mxu0 (!%p211_p3), %v3012_v0  ;;  %2824 = vmatprep.subr.bf16.mxu1 (!%p211_p3), %v3012_v0 }
   0xe   : > { %s4074_s15 = smov (!%p254_p4, %s3002_s15), 1 }
   0xf   : > { %s2840_s21 = smul.u32 216, %s4074_s15  ;;  %s2821_s30 = sshll.u32 %s4074_s15, 8 }
  0x10   : > { %2142 = vmatpush1.bf16.msra.mxu0 %v2927_v3  ;;  %2833 = vmatpush1.bf16.msra.mxu1 %v2927_v3  ;;  %s3961_s7 = scalar_lea.vmem %s4068_s4, %s2821_s30 }
  0x11   : > { %s3079_s26 = scalar_lea.vmem %s4064_s0, %s2840_s21  ;;  %2143 = vmatprep.subr.bf16.mxu0 %v3012_v0  ;;  %2825 = vmatprep.subr.bf16.mxu1 %v3012_v0 }
  0x12   : > { %v3085_v4 = vld [vmem:[%s3079_s26 + $0x6c] sm:$0xff]   ;;  %v3093_v6 = vld [vmem:[%s3079_s26 + $0x14] ss:$0 sps:$4 sm:$0x11]   ;;  %v2876_v7 = vld [vmem:[%s3079_s26] sm:$0xff]  }
  0x13   : > { %v3088_v5 = vld [vmem:[%s3079_s26 + $0xc] sm:$0xff]   ;;  %970 = vrot.lane.b32.xlu1 %v3085_v4, %s3013_s29  ;;  %v2878_v9 = vld [vmem:[%s3079_s26 + $0x60] sm:$0xff]   ;;  %v1259_v11 = vrot.slane %v3093_v6, 1  ;;  %v2877_v12 = vld [vmem:[%s3079_s26 + $0x8] ss:$0 sps:$4 sm:$0x11]  }
  0x14   : > { %954 = vrot.lane.b32.xlu0 %v3088_v5, %s3013_s29  ;;  %v1258_v8 = vrot.slane %v3088_v5, 1  ;;  %v794_v13 = vrot.slane %v2876_v7, 1  ;;  %v818_v14 = vrot.slane %v2878_v9, 1  ;;  %v795_v16 = vrot.slane %v2877_v12, 1  ;;  %2144 = vmatpush1.bf16.msra.mxu0 %v2928_v10  ;;  %v3123_v36 = vld [vmem:[%s3079_s26 + $0x78] sm:$0xff]   ;;  %v2885_v62 = vld [vmem:[%s3079_s26 + $0x6c] sm:$0xff]  }
  0x15   : > { %v2879_v17 = vld [vmem:[%s3079_s26 + $0x68] ss:$0 sps:$4 sm:$0x11]   ;;  %v570_v18 = vshrl.u32 %v2876_v7, 16  ;;  %v572_v19 = vshll.u32 %v2876_v7, 16  ;;  %v577_v20 = vshll.u32 %v2877_v12, 16  ;;  %2834 = vmatpush1.bf16.msra.mxu1 %v2928_v10  ;;  %2145 = vmatprep.subr.bf16.mxu0 %v3012_v0 }
  0x16   : > { %v1260_v15 = vsel %vm793_vm0, %v1258_v8, %v1259_v11  ;;  %v1282_v21 = vrot.slane %v3085_v4, 1  ;;  %v796_v23 = vsel %vm793_vm0, %v794_v13, %v795_v16  ;;  %v819_v24 = vrot.slane %v2879_v17, 1  ;;  %v2880_v25 = vld [vmem:[%s3079_s26 + $0x74] ss:$0 sps:$4 sm:$0x11]   ;;  %v3128_v41 = vld [vmem:[%s3079_s26 + $0x18] sm:$0xff]   ;;  %2826 = vmatprep.subr.bf16.mxu1 %v3012_v0 }
  0x17   : > { %v666_v26 = vshrl.u32 %v2878_v9, 16  ;;  %v668_v27 = vshll.u32 %v2878_v9, 16  ;;  %842 = vrot.lane.b32.xlu1 %v796_v23, %s3015_s9  ;;  %v574_v28 = vrot.slane %v572_v19, 1  ;;  %v579_v29 = vrot.slane %v577_v20, 1  ;;  %v2887_v2 = vld [vmem:[%s3079_s26 + $0xc] sm:$0xff]  }
  0x18   : > { %1306 = vrot.lane.b32.xlu0 %v1260_v15, %s3014_s6  ;;  %v673_v30 = vshll.u32 %v2879_v17, 16  ;;  %v1131_v31 = vshrl.u32 %v3085_v4, 16  ;;  %v820_v32 = vsel %vm793_vm0, %v818_v14, %v819_v24  ;;  %v1283_v33 = vrot.slane %v2880_v25, 1  ;;  %v3136_v48 = vld [vmem:[%s3079_s26 + $0x80] ss:$0 sps:$4 sm:$0x11]   ;;  %2146 = vmatpush1.bf16.msra.mxu0 %v2931_v22 }
  0x19   : > { %v670_v34 = vrot.slane %v668_v27, 1  ;;  %v1133_v35 = vshll.u32 %v3085_v4, 16  ;;  %v575_v37 = vor.u32 %v574_v28, %v570_v18  ;;  %v1138_v39 = vshll.u32 %v2880_v25, 16  ;;  %2835 = vmatpush1.bf16.msra.mxu1 %v2931_v22  ;;  %v3144_v56 = vld [vmem:[%s3079_s26 + $0x20] ss:$0 sps:$4 sm:$0x11]   ;;  %2147 = vmatprep.subr.bf16.mxu0 %v3012_v0 }
  0x1a   : > { %v675_v38 = vrot.slane %v673_v30, 1  ;;  %v1035_v40 = vshrl.u32 %v3088_v5, 16  ;;  %v1037_v44 = vshll.u32 %v3088_v5, 16  ;;  %v1042_v47 = vshll.u32 %v3093_v6, 16  ;;  %2827 = vmatprep.subr.bf16.mxu1 %v3012_v0  ;;  %v2889_v22 = vld [vmem:[%s3079_s26 + $0x78] sm:$0xff]  }
  0x1b   : > { %v671_v42 = vor.u32 %v670_v34, %v666_v26  ;;  %v1135_v43 = vrot.slane %v1133_v35, 1  ;;  %858 = vrot.lane.b32.xlu1 %v820_v32, %s3015_s9  ;;  %v580_v45 = vsel %vm568_vm1, %v575_v37, %v579_v29  ;;  %v1140_v46 = vrot.slane %v1138_v39, 1  ;;  %v2886_v63 = vld [vmem:[%s3079_s26 + $0x74] ss:$0 sps:$4 sm:$0x11]   ;;  %v2890_v26 = vld [vmem:[%s3079_s26 + $0x18] sm:$0xff]  }
  0x1c   : > { %761 = vrot.lane.b32.xlu0 %v580_v45, %s3016_s10  ;;  %v1284_v49 = vsel %vm793_vm0, %v1282_v21, %v1283_v33  ;;  %v1039_v51 = vrot.slane %v1037_v44, 1  ;;  %v1597_v52 = vshll.u32 %v3123_v36, 16  ;;  %v1044_v54 = vrot.slane %v1042_v47, 1  ;;  %v2888_v7 = vld [vmem:[%s3079_s26 + $0x14] ss:$0 sps:$4 sm:$0x11]  }
  0x1d   : > { %v1136_v50 = vor.u32 %v1135_v43, %v1131_v31  ;;  %v676_v53 = vsel %vm568_vm1, %v671_v42, %v675_v38  ;;  %v1595_v55 = vshrl.u32 %v3123_v36, 16  ;;  %v1602_v58 = vshll.u32 %v3136_v48, 16  ;;  %v2891_v27 = vld [vmem:[%s3079_s26 + $0x80] ss:$0 sps:$4 sm:$0x11]   ;;  %v3181_v47 = vld [vmem:[%s3079_s26 + $0x84] sm:$0xff]  }
  0x1e   : > { %v1040_v57 = vor.u32 %v1039_v51, %v1035_v40  ;;  %v1501_v59 = vshll.u32 %v3128_v41, 16  ;;  %v1599_v60 = vrot.slane %v1597_v52, 1  ;;  %v1506_v61 = vshll.u32 %v3144_v56, 16  ;;  %v2892_v32 = vld [vmem:[%s3079_s26 + $0x20] ss:$0 sps:$4 sm:$0x11]  }
  0x1f   : > { %1322 = vrot.lane.b32.xlu1 %v1284_v49, %s3014_s6  ;;  %v1141_v1 = vsel %vm568_vm1, %v1136_v50, %v1140_v46  ;;  %v1499_v4 = vshrl.u32 %v3128_v41, 16  ;;  %v680_v6 = vshll.u32 %v2885_v62, 16  ;;  %v584_v8 = vshll.u32 %v2887_v2, 16 }
  0x20   : > { %777 = vrot.lane.b32.xlu0 %v676_v53, %s3016_s10  ;;  %v1045_v3 = vsel %vm568_vm1, %v1040_v57, %v1044_v54  ;;  %v1503_v5 = vrot.slane %v1501_v59, 1  ;;  %v1600_v9 = vor.u32 %v1599_v60, %v1595_v55  ;;  %v1604_v10 = vrot.slane %v1602_v58, 1  ;;  %v3186_v53 = vld [vmem:[%s3079_s26 + $0x24] sm:$0xff]   ;;  %v3189_v54 = vld [vmem:[%s3079_s26 + $0x8c] ss:$0 sps:$4 sm:$0x11]  }
  0x21   : > { %v1508_v11 = vrot.slane %v1506_v61, 1  ;;  %v678_v12 = vshrl.u32 %v2885_v62, 16  ;;  %v682_v13 = vrot.slane %v680_v6, 1  ;;  %v685_v14 = vshll.u32 %v2886_v63, 16 }
  0x22   : > { %v582_v15 = vshrl.u32 %v2887_v2, 16  ;;  %v1504_v16 = vor.u32 %v1503_v5, %v1499_v4  ;;  %v586_v17 = vrot.slane %v584_v8, 1  ;;  %v589_v18 = vshll.u32 %v2888_v7, 16  ;;  %v3194_v58 = vld [vmem:[%s3079_s26 + $0x2c] ss:$0 sps:$4 sm:$0x11]  }
  0x23   : > { %1242 = vrot.lane.b32.xlu1 %v1141_v1, %s3017_s11  ;;  %v1605_v19 = vsel %vm568_vm1, %v1600_v9, %v1604_v10  ;;  %v683_v20 = vor.u32 %v682_v13, %v678_v12  ;;  %v687_v21 = vrot.slane %v685_v14, 1  ;;  %v821_v28 = vrot.slane %v2885_v62, 1  ;;  %v2899_v5 = vld [vmem:[%s3079_s26 + $0x18] sm:$0xff]   ;;  %v2900_v12 = vld [vmem:[%s3079_s26 + $0x20] ss:$0 sps:$4 sm:$0x11]  }
  0x24   : > { %1226 = vrot.lane.b32.xlu0 %v1045_v3, %s3017_s11  ;;  %v1509_v23 = vsel %vm568_vm1, %v1504_v16, %v1508_v11  ;;  %v587_v24 = vor.u32 %v586_v17, %v582_v15  ;;  %v591_v25 = vrot.slane %v589_v18, 1  ;;  %v822_v29 = vrot.slane %v2886_v63, 1  ;;  %v2897_v63 = vld [vmem:[%s3079_s26 + $0x78] sm:$0xff]  }
  0x25   : > { %v688_v30 = vsel %vm568_vm1, %v683_v20, %v687_v21  ;;  %v1145_v31 = vshll.u32 %v2889_v22, 16  ;;  %v797_v34 = vrot.slane %v2887_v2, 1  ;;  %v798_v35 = vrot.slane %v2888_v7, 1  ;;  %v2898_v7 = vld [vmem:[%s3079_s26 + $0x80] ss:$0 sps:$4 sm:$0x11]  }
  0x26   : > { %v592_v33 = vsel %vm568_vm1, %v587_v24, %v591_v25  ;;  %v1049_v37 = vshll.u32 %v2890_v26, 16  ;;  %v823_v38 = vsel %vm793_vm0, %v821_v28, %v822_v29  ;;  %v1143_v39 = vshrl.u32 %v2889_v22, 16  ;;  %v2901_v29 = vld [vmem:[%s3079_s26 + $0x84] sm:$0xff]  }
  0x27   : > { %1434 = vrot.lane.b32.xlu1 %v3123_v36, %s3018_s12  ;;  %v1147_v40 = vrot.slane %v1145_v31, 1  ;;  %v1150_v42 = vshll.u32 %v2891_v27, 16  ;;  %v1054_v43 = vshll.u32 %v2892_v32, 16  ;;  %v799_v44 = vsel %vm793_vm0, %v797_v34, %v798_v35 }
  0x28   : > { %1418 = vrot.lane.b32.xlu0 %v3128_v41, %s3018_s12  ;;  %v1047_v45 = vshrl.u32 %v2890_v26, 16  ;;  %v1051_v46 = vrot.slane %v1049_v37, 1  ;;  %v1609_v55 = vshll.u32 %v3181_v47, 16  ;;  %v1285_v57 = vrot.slane %v2889_v22, 1 }
  0x29   : > { %v1148_v49 = vor.u32 %v1147_v40, %v1143_v39  ;;  %v1152_v50 = vrot.slane %v1150_v42, 1  ;;  %v1056_v51 = vrot.slane %v1054_v43, 1  ;;  %v1286_v60 = vrot.slane %v2891_v27, 1  ;;  %v2903_v40 = vld [vmem:[%s3079_s26 + $0x8c] ss:$0 sps:$4 sm:$0x11]  }
  0x2a   : > { %v1052_v52 = vor.u32 %v1051_v46, %v1047_v45  ;;  %v1261_v61 = vrot.slane %v2890_v26, 1  ;;  %v1262_v62 = vrot.slane %v2892_v32, 1  ;;  %v1607_v2 = vshrl.u32 %v3181_v47, 16 }
  0x2b   : > { %1706 = vrot.lane.b32.xlu1 %v1605_v19, %s3019_s13  ;;  %v1153_v59 = vsel %vm568_vm1, %v1148_v49, %v1152_v50  ;;  %v1511_v3 = vshrl.u32 %v3186_v53, 16  ;;  %v1513_v4 = vshll.u32 %v3186_v53, 16  ;;  %v1611_v6 = vrot.slane %v1609_v55, 1 }
  0x2c   : > { %1690 = vrot.lane.b32.xlu0 %v1509_v23, %s3019_s13  ;;  %v1057_v1 = vsel %vm568_vm1, %v1052_v52, %v1056_v51  ;;  %v1614_v8 = vshll.u32 %v3189_v54, 16  ;;  %v1518_v9 = vshll.u32 %v3194_v58, 16  ;;  %v1287_v10 = vsel %vm793_vm0, %v1285_v57, %v1286_v60  ;;  %v3233_v60 = vld [vmem:[%s3079_s26 + $0x90] sm:$0xff]  }
  0x2d   : > { %v692_v11 = vshll.u32 %v2897_v63, 16  ;;  %v1263_v13 = vsel %vm793_vm0, %v1261_v61, %v1262_v62  ;;  %v1515_v14 = vrot.slane %v1513_v4, 1  ;;  %v596_v15 = vshll.u32 %v2899_v5, 16  ;;  %v3237_v61 = vld [vmem:[%s3079_s26 + $0x30] sm:$0xff]  }
  0x2e   : > { %v1612_v16 = vor.u32 %v1611_v6, %v1607_v2  ;;  %v1616_v17 = vrot.slane %v1614_v8, 1  ;;  %v690_v18 = vshrl.u32 %v2897_v63, 16  ;;  %v1520_v19 = vrot.slane %v1518_v9, 1 }
  0x2f   : > { %779 = vrot.lane.b32.xlu1 %v688_v30, %s3016_s10  ;;  %v694_v20 = vrot.slane %v692_v11, 1  ;;  %v697_v21 = vshll.u32 %v2898_v7, 16  ;;  %v1516_v23 = vor.u32 %v1515_v14, %v1511_v3  ;;  %v598_v24 = vrot.slane %v596_v15, 1  ;;  %v3241_v3 = vld [vmem:[%s3079_s26 + $0x98] ss:$0 sps:$4 sm:$0x11]  }
  0x30   : > { %763 = vrot.lane.b32.xlu0 %v592_v33, %s3016_s10  ;;  %v601_v25 = vshll.u32 %v2900_v12, 16  ;;  %v2902_v33 = vld [vmem:[%s3079_s26 + $0x24] sm:$0xff]   ;;  %v824_v34 = vrot.slane %v2897_v63, 1  ;;  %v825_v35 = vrot.slane %v2898_v7, 1  ;;  %v801_v39 = vrot.slane %v2900_v12, 1 }
  0x31   : > { %v695_v27 = vor.u32 %v694_v20, %v690_v18  ;;  %v699_v28 = vrot.slane %v697_v21, 1  ;;  %v1521_v30 = vsel %vm568_vm1, %v1516_v23, %v1520_v19  ;;  %v1157_v42 = vshll.u32 %v2901_v29, 16  ;;  %v3252_v11 = vld [vmem:[%s3079_s26 + $0x84] sm:$0xff]  }
  0x32   : > { %v603_v32 = vrot.slane %v601_v25, 1  ;;  %v1061_v45 = vshll.u32 %v2902_v33, 16  ;;  %v1155_v46 = vshrl.u32 %v2901_v29, 16  ;;  %v826_v49 = vsel %vm793_vm0, %v824_v34, %v825_v35  ;;  %v3256_v14 = vld [vmem:[%s3079_s26 + $0x24] sm:$0xff]   ;;  %v2935_v35 = vld [vmem:[%s4065_s1 + $0x30] sm:$0xff]  }
  0x33   : > { %860 = vrot.lane.b32.xlu1 %v823_v38, %s3015_s9  ;;  %v700_v37 = vsel %vm568_vm1, %v695_v27, %v699_v28  ;;  %v800_v38 = vrot.slane %v2899_v5, 1  ;;  %v1159_v50 = vrot.slane %v1157_v42, 1  ;;  %v1162_v51 = vshll.u32 %v2903_v40, 16  ;;  %v3271_v25 = vld [vmem:[%s3079_s26 + $0x2c] ss:$0 sps:$4 sm:$0x11]  }
  0x34   : > { %844 = vrot.lane.b32.xlu0 %v799_v44, %s3015_s9  ;;  %v2904_v44 = vld [vmem:[%s3079_s26 + $0x2c] ss:$0 sps:$4 sm:$0x11]   ;;  %v1059_v55 = vshrl.u32 %v2902_v33, 16  ;;  %v1063_v57 = vrot.slane %v1061_v45, 1  ;;  %v1621_v4 = vshll.u32 %v3233_v60, 16 }
  0x35   : > { %v802_v52 = vsel %vm793_vm0, %v800_v38, %v801_v39  ;;  %v1160_v62 = vor.u32 %v1159_v50, %v1155_v46  ;;  %v1164_v63 = vrot.slane %v1162_v51, 1  ;;  %v1525_v6 = vshll.u32 %v3237_v61, 16  ;;  %v2934_v27 = vld [vmem:[%s4065_s1 + $0x28] sm:$0xff]   ;;  %v2938_v45 = vld [vmem:[%s4065_s1 + $0x38] sm:$0xff]   ;;  %v3301_v51 = vld [vmem:[%s3079_s26 + $0x30] sm:$0xff]  }
  0x36   : > { %v1288_v8 = vrot.slane %v2901_v29, 1  ;;  %v1289_v9 = vrot.slane %v2903_v40, 1  ;;  %v1619_v15 = vshrl.u32 %v3233_v60, 16  ;;  %v1523_v18 = vshrl.u32 %v3237_v61, 16  ;;  %2148 = vmatpush1.bf16.msra.mxu0 %v2934_v27  ;;  %2836 = vmatpush1.bf16.msra.mxu1 %v2934_v27 }
  0x37   : > { %972 = vrot.lane.b32.xlu1 %v2889_v22, %s3013_s29  ;;  %v594_v22 = vshrl.u32 %v2899_v5, 16  ;;  %v3246_v5 = vld [vmem:[%s3079_s26 + $0x38] ss:$0 sps:$4 sm:$0x11]   ;;  %v1165_v7 = vsel %vm568_vm1, %v1160_v62, %v1164_v63  ;;  %v1527_v19 = vrot.slane %v1525_v6, 1  ;;  %v704_v23 = vshll.u32 %v3252_v11, 16  ;;  %2149 = vmatprep.subr.bf16.mxu0 %v3012_v0 }
  0x38   : > { %956 = vrot.lane.b32.xlu0 %v2890_v26, %s3013_s29  ;;  %v1617_v26 = vsel %vm568_vm1, %v1612_v16, %v1616_v17  ;;  %v1626_v16 = vshll.u32 %v3241_v3, 16  ;;  %v1623_v17 = vrot.slane %v1621_v4, 1  ;;  %v1530_v20 = vshll.u32 %v3246_v5, 16  ;;  %2828 = vmatprep.subr.bf16.mxu1 %v3012_v0 }
  0x39   : > { %v599_v31 = vor.u32 %v598_v24, %v594_v22  ;;  %v1290_v21 = vsel %vm793_vm0, %v1288_v8, %v1289_v9  ;;  %v3266_v22 = vld [vmem:[%s3079_s26 + $0x8c] ss:$0 sps:$4 sm:$0x11]   ;;  %v606_v34 = vshrl.u32 %v3256_v14, 16  ;;  %v613_v39 = vshll.u32 %v3271_v25, 16 }
  0x3a   : > { %v1628_v28 = vrot.slane %v1626_v16, 1  ;;  %2150 = vmatpush1.bf16.msra.mxu0 %v2935_v35  ;;  %2837 = vmatpush1.bf16.msra.mxu1 %v2935_v35  ;;  %v1722_v62 = vrot.slane %v3128_v41, 1  ;;  %v1723_v63 = vrot.slane %v3144_v56, 1  ;;  %v803_v4 = vrot.slane %v3256_v14, 1 }
  0x3b   : > { %1244 = vrot.lane.b32.xlu1 %v1153_v59, %s3017_s11  ;;  %v604_v43 = vsel %vm568_vm1, %v599_v31, %v603_v32  ;;  %v1066_v59 = vshll.u32 %v2904_v44, 16  ;;  %v1624_v31 = vor.u32 %v1623_v17, %v1619_v15  ;;  %v706_v32 = vrot.slane %v704_v23, 1  ;;  %2151 = vmatprep.subr.bf16.mxu0 %v3012_v0  ;;  %v3344_v17 = vld [vmem:[%s3079_s26 + $0x9c] sm:$0xff]  }
  0x3c   : > { %1228 = vrot.lane.b32.xlu0 %v1057_v1, %s3017_s11  ;;  %v1064_v1 = vor.u32 %v1063_v57, %v1059_v55  ;;  %v615_v50 = vrot.slane %v613_v39, 1  ;;  %v3306_v55 = vld [vmem:[%s3079_s26 + $0x98] ss:$0 sps:$4 sm:$0x11]   ;;  %2829 = vmatprep.subr.bf16.mxu1 %v3012_v0  ;;  %v828_v57 = vrot.slane %v3266_v22, 1  ;;  %v1747_v8 = vrot.slane %v3136_v48, 1 }
  0x3d   : > { %v1068_v2 = vrot.slane %v1066_v59, 1  ;;  %v1629_v40 = vsel %vm568_vm1, %v1624_v31, %v1628_v28  ;;  %v3312_v59 = vld [vmem:[%s3079_s26 + $0x38] ss:$0 sps:$4 sm:$0x11]   ;;  %v804_v56 = vrot.slane %v3271_v25, 1  ;;  %v1724_v9 = vsel %vm793_vm0, %v1722_v62, %v1723_v63  ;;  %v3360_v28 = vld [vmem:[%s3079_s26 + $0x90] sm:$0xff]  }
  0x3e   : > { %2152 = vmatpush1.bf16.msra.mxu0 %v2938_v45  ;;  %2838 = vmatpush1.bf16.msra.mxu1 %v2938_v45  ;;  %v1078_v16 = vshll.u32 %v3312_v59, 16  ;;  %v1292_v25 = vrot.slane %v3306_v55, 1  ;;  %v1633_v27 = vshll.u32 %v3344_v17, 16  ;;  %v1631_v35 = vshrl.u32 %v3344_v17, 16 }
  0x3f   : > { %1324 = vrot.lane.b32.xlu1 %v1287_v10, %s3014_s6  ;;  %v1264_v10 = vrot.slane %v2902_v33, 1  ;;  %v1069_v12 = vsel %vm568_vm1, %v1064_v1, %v1068_v2  ;;  %v1746_v1 = vrot.slane %v3123_v36, 1  ;;  %v1073_v36 = vshll.u32 %v3301_v51, 16  ;;  %2153 = vmatprep.subr.bf16.mxu0 %v3012_v0  ;;  %v2924_v39 = vld [vmem:[%s3079_s26 + $0x98] ss:$0 sps:$4 sm:$0x11]  }
  0x40   : > { %1308 = vrot.lane.b32.xlu0 %v1263_v13, %s3014_s6  ;;  %v1265_v13 = vrot.slane %v2904_v44, 1  ;;  %v3294_v44 = vld [vmem:[%s3079_s26 + $0x90] sm:$0xff]   ;;  %2830 = vmatprep.subr.bf16.mxu1 %v3012_v0  ;;  %v805_v0 = vsel %vm793_vm0, %v803_v4, %v804_v56 }
  0x41   : > { %v1169_v6 = vshll.u32 %v3294_v44, 16  ;;  %2801 = vmatprep.mubr.msk.bf16.mxu0 %vm1770_vm2, %v1724_v9  ;;  %v1075_v15 = vrot.slane %v1073_v36, 1  ;;  %v1291_v23 = vrot.slane %v3294_v44, 1 }
  0x42   : > { %v1266_v24 = vsel %vm793_vm0, %v1264_v10, %v1265_v13  ;;  %v1748_v10 = vsel %vm793_vm0, %v1746_v1, %v1747_v8  ;;  %v1174_v13 = vshll.u32 %v3306_v55, 16 }
  0x43   : > { %1436 = vrot.lane.b32.xlu1 %v3181_v47, %s3018_s12  ;;  %2809 = vmatprep.mubr.msk.bf16.mxu1 %vm1770_vm2, %v1748_v10  ;;  %v3396_v10 = vld [vmem:[%s3079_s26 + $0x3c] sm:$0xff]  }
  0x44   : > { %1420 = vrot.lane.b32.xlu0 %v3186_v53, %s3018_s12 }
  0x47   : > { %1708 = vrot.lane.b32.xlu1 %v1617_v26, %s3019_s13  ;;  %v608_v26 = vshll.u32 %v3256_v14, 16  ;;  %v1071_v14 = vshrl.u32 %v3301_v51, 16 }
  0x48   : > { %1692 = vrot.lane.b32.xlu0 %v1521_v30, %s3019_s13  ;;  %v702_v30 = vshrl.u32 %v3252_v11, 16 }
  0x49   : > { %v610_v38 = vrot.slane %v608_v26, 1  ;;  %v1267_v26 = vrot.slane %v3301_v51, 1 }
  0x4a   : > { %v707_v42 = vor.u32 %v706_v32, %v702_v30  ;;  %v3366_v30 = vld [vmem:[%s3079_s26 + $0x44] ss:$0 sps:$4 sm:$0x11]  }
  0x4b   : > { %781 = vrot.lane.b32.xlu1 %v700_v37, %s3016_s10  ;;  %v1528_v37 = vor.u32 %v1527_v19, %v1523_v18  ;;  %v1176_v19 = vrot.slane %v1174_v13, 1  ;;  %v1542_v45 = vshll.u32 %v3366_v30, 16 }
  0x4c   : > { %765 = vrot.lane.b32.xlu0 %v604_v43, %s3016_s10 }
  0x4d   : > { %v1544_v1 = vrot.slane %v1542_v45, 1 }
  0x4f   : > { %862 = vrot.lane.b32.xlu1 %v826_v49, %s3015_s9  ;;  %v611_v49 = vor.u32 %v610_v38, %v606_v34  ;;  %v2925_v34 = vld [vmem:[%s3079_s26 + $0x30] sm:$0xff]   ;;  %v1293_v38 = vsel %vm793_vm0, %v1291_v23, %v1292_v25 }
  0x50   : > { %846 = vrot.lane.b32.xlu0 %v802_v52, %s3015_s9  ;;  %v827_v52 = vrot.slane %v3252_v11, 1  ;;  %v1167_v11 = vshrl.u32 %v3294_v44, 16 }
  0x51   : > { %v616_v41 = vsel %vm568_vm1, %v611_v49, %v615_v50  ;;  %v2926_v49 = vld [vmem:[%s3079_s26 + $0x38] ss:$0 sps:$4 sm:$0x11]   ;;  %v620_v50 = vshll.u32 %v2925_v34, 16 }
  0x52   : > { %v829_v48 = vsel %vm793_vm0, %v827_v52, %v828_v57  ;;  %v721_v57 = vshll.u32 %v2924_v39, 16  ;;  %v625_v4 = vshll.u32 %v2926_v49, 16 }
  0x53   : > { %974 = vrot.lane.b32.xlu1 %v2901_v29, %s3013_s29  ;;  %v1532_v29 = vrot.slane %v1530_v20, 1  ;;  %v3348_v20 = vld [vmem:[%s3079_s26 + $0x3c] sm:$0xff]  }
  0x54   : > { %958 = vrot.lane.b32.xlu0 %v2902_v33, %s3013_s29  ;;  %v709_v33 = vshll.u32 %v3266_v22, 16  ;;  %v1080_v22 = vrot.slane %v1078_v16, 1  ;;  %v1537_v31 = vshll.u32 %v3348_v20, 16  ;;  %v627_v9 = vrot.slane %v625_v4, 1 }
  0x55   : > { %v1533_v46 = vsel %vm568_vm1, %v1528_v37, %v1532_v29  ;;  %v806_v16 = vrot.slane %v2925_v34, 1 }
  0x56   : > { %v711_v43 = vrot.slane %v709_v33, 1  ;;  %v1268_v33 = vrot.slane %v3312_v59, 1  ;;  %v618_v59 = vshrl.u32 %v2925_v34, 16 }
  0x57   : > { %1246 = vrot.lane.b32.xlu1 %v1165_v7, %s3017_s11  ;;  %v2941_v7 = vld [vmem:[%s4065_s1 + $0x40] sm:$0xff]  }
  0x58   : > { %1230 = vrot.lane.b32.xlu0 %v1069_v12, %s3017_s11  ;;  %v712_v2 = vsel %vm568_vm1, %v707_v42, %v711_v43  ;;  %v1171_v12 = vrot.slane %v1169_v6, 1  ;;  %2154 = vmatpush1.bf16.msra.mxu0 %v2941_v7  ;;  %v1635_v42 = vrot.slane %v1633_v27, 1  ;;  %v1535_v43 = vshrl.u32 %v3348_v20, 16  ;;  %v3389_v6 = vld [vmem:[%s3079_s26 + $0x9c] sm:$0xff]  }
  0x59   : > { %2839 = vmatpush1.bf16.msra.mxu1 %v2941_v7  ;;  %v1179_v23 = vshrl.u32 %v3389_v6, 16 }
  0x5a   : > { %v1172_v18 = vor.u32 %v1171_v12, %v1167_v11  ;;  %v1636_v62 = vor.u32 %v1635_v42, %v1631_v35  ;;  %v3401_v11 = vld [vmem:[%s3079_s26 + $0xa4] ss:$0 sps:$4 sm:$0x11]   ;;  %v1181_v12 = vshll.u32 %v3389_v6, 16 }
  0x5b   : > { %1326 = vrot.lane.b32.xlu1 %v1290_v21, %s3014_s6  ;;  %v1076_v21 = vor.u32 %v1075_v15, %v1071_v14  ;;  %v2933_v14 = vld [vmem:[%s3079_s26 + $0x44] ss:$0 sps:$4 sm:$0x11]  }
  0x5c   : > { %1310 = vrot.lane.b32.xlu0 %v1266_v24, %s3014_s6  ;;  %v3352_v24 = vld [vmem:[%s3079_s26 + $0xa4] ss:$0 sps:$4 sm:$0x11]   ;;  %v1177_v29 = vsel %vm568_vm1, %v1172_v18, %v1176_v19  ;;  %v807_v18 = vrot.slane %v2926_v49, 1  ;;  %v1085_v19 = vshll.u32 %v3396_v10, 16  ;;  %v1183_v25 = vrot.slane %v1181_v12, 1 }
  0x5d   : > { %v1081_v32 = vsel %vm568_vm1, %v1076_v21, %v1080_v22  ;;  %v1638_v37 = vshll.u32 %v3352_v24, 16  ;;  %v1294_v49 = vrot.slane %v3389_v6, 1 }
  0x5e   : > { %v1087_v34 = vrot.slane %v1085_v19, 1  ;;  %v1184_v35 = vor.u32 %v1183_v25, %v1179_v23 }
  0x5f   : > { %1438 = vrot.lane.b32.xlu1 %v3233_v60, %s3018_s12  ;;  %v1640_v52 = vrot.slane %v1638_v37, 1 }
  0x60   : > { %1422 = vrot.lane.b32.xlu0 %v3237_v61, %s3018_s12 }
  0x61   : > { %v1641_v7 = vsel %vm568_vm1, %v1636_v62, %v1640_v52  ;;  %v1295_v52 = vrot.slane %v3401_v11, 1 }
  0x63   : > { %1710 = vrot.lane.b32.xlu1 %v1629_v40, %s3019_s13  ;;  %v716_v40 = vshll.u32 %v3360_v28, 16 }
  0x64   : > { %1694 = vrot.lane.b32.xlu0 %v1533_v46, %s3019_s13  ;;  %v1269_v46 = vsel %vm793_vm0, %v1267_v26, %v1268_v33  ;;  %v1186_v26 = vshll.u32 %v3401_v11, 16  ;;  %v1083_v33 = vshrl.u32 %v3396_v10, 16 }
  0x65   : > { %v718_v55 = vrot.slane %v716_v40, 1 }
  0x66   : > { %v1188_v37 = vrot.slane %v1186_v26, 1  ;;  %v2978_v26 = vld [vmem:[%s3079_s26] sm:$0xff]  }
  0x67   : > { %783 = vrot.lane.b32.xlu1 %v712_v2, %s3016_s10  ;;  %v622_v2 = vrot.slane %v620_v50, 1  ;;  %v3440_v50 = vld [vmem:[%s3079_s26 + $0x9c] sm:$0xff]  }
  0x68   : > { %767 = vrot.lane.b32.xlu0 %v616_v41, %s3016_s10  ;;  %v723_v41 = vrot.slane %v721_v57, 1  ;;  %v1271_v57 = vrot.slane %v2933_v14, 1 }
  0x69   : > { %v623_v36 = vor.u32 %v622_v2, %v618_v59  ;;  %v3448_v59 = vld [vmem:[%s3079_s26 + $0x3c] sm:$0xff]  }
  0x6a   : > { %v630_v25 = vshrl.u32 %v3448_v59, 16 }
  0x6b   : > { %864 = vrot.lane.b32.xlu1 %v829_v48, %s3015_s9  ;;  %v830_v48 = vrot.slane %v3360_v28, 1  ;;  %v628_v15 = vsel %vm568_vm1, %v623_v36, %v627_v9  ;;  %v728_v36 = vshll.u32 %v3440_v50, 16  ;;  %v3463_v9 = vld [vmem:[%s3079_s26 + $0x44] ss:$0 sps:$4 sm:$0x11]  }
  0x6c   : > { %848 = vrot.lane.b32.xlu0 %v805_v0, %s3015_s9  ;;  %v831_v0 = vrot.slane %v2924_v39, 1 }
  0x6d   : > { %v730_v19 = vrot.slane %v728_v36, 1 }
  0x6e   : > { %v832_v27 = vsel %vm793_vm0, %v830_v48, %v831_v0  ;;  %v1296_v48 = vsel %vm793_vm0, %v1294_v49, %v1295_v52 }
  0x6f   : > { %976 = vrot.lane.b32.xlu1 %v3294_v44, %s3013_s29  ;;  %v1539_v44 = vrot.slane %v1537_v31, 1  ;;  %v3422_v31 = vld [vmem:[%s3079_s26 + $0x48] sm:$0xff]  }
  0x70   : > { %960 = vrot.lane.b32.xlu0 %v3301_v51, %s3013_s29  ;;  %v714_v51 = vshrl.u32 %v3360_v28, 16  ;;  %v1090_v28 = vshll.u32 %v2933_v14, 16  ;;  %v1547_v2 = vshrl.u32 %v3422_v31, 16 }
  0x71   : > { %v1540_v63 = vor.u32 %v1539_v44, %v1535_v43  ;;  %v3435_v43 = vld [vmem:[%s3079_s26 + $0x50] ss:$0 sps:$4 sm:$0x11]   ;;  %v1549_v44 = vshll.u32 %v3422_v31, 16 }
  0x72   : > { %v719_v8 = vor.u32 %v718_v55, %v714_v51  ;;  %v1092_v40 = vrot.slane %v1090_v28, 1  ;;  %v1189_v51 = vsel %vm568_vm1, %v1184_v35, %v1188_v37  ;;  %v1270_v55 = vrot.slane %v3396_v10, 1  ;;  %v2979_v28 = vld [vmem:[%s3079_s26 + $0x60] sm:$0xff]  }
  0x73   : > { %1248 = vrot.lane.b32.xlu1 %v1177_v29, %s3017_s11  ;;  %v1545_v56 = vsel %vm568_vm1, %v1540_v63, %v1544_v1  ;;  %v3419_v29 = vld [vmem:[%s3079_s26 + $0xa8] sm:$0xff]  }
  0x74   : > { %1232 = vrot.lane.b32.xlu0 %v1081_v32, %s3017_s11  ;;  %v724_v13 = vsel %vm568_vm1, %v719_v8, %v723_v41  ;;  %v808_v32 = vsel %vm793_vm0, %v806_v16, %v807_v18  ;;  %v1645_v42 = vshll.u32 %v3419_v29, 16  ;;  %v1643_v62 = vshrl.u32 %v3419_v29, 16 }
  0x75   : > { %v1554_v8 = vshll.u32 %v3435_v43, 16  ;;  %v1272_v11 = vsel %vm793_vm0, %v1270_v55, %v1271_v57  ;;  %v726_v18 = vshrl.u32 %v3440_v50, 16 }
  0x76   : > { %v1647_v63 = vrot.slane %v1645_v42, 1 }
  0x77   : > { %1328 = vrot.lane.b32.xlu1 %v1293_v38, %s3014_s6  ;;  %v3428_v38 = vld [vmem:[%s3079_s26 + $0xb0] ss:$0 sps:$4 sm:$0x11]  }
  0x78   : > { %1312 = vrot.lane.b32.xlu0 %v1269_v46, %s3014_s6  ;;  %v1088_v46 = vor.u32 %v1087_v34, %v1083_v33  ;;  %v1650_v1 = vshll.u32 %v3428_v38, 16  ;;  %v637_v34 = vshll.u32 %v3463_v9, 16 }
  0x7a   : > { %v1652_v0 = vrot.slane %v1650_v1, 1  ;;  %v639_v57 = vrot.slane %v637_v34, 1  ;;  %v1726_v1 = vrot.slane %v3194_v58, 1  ;;  %v1750_v58 = vrot.slane %v3189_v54, 1 }
  0x7b   : > { %1440 = vrot.lane.b32.xlu1 %v3344_v17, %s3018_s12  ;;  %v1734_v54 = vrot.slane %v3422_v31, 1 }
  0x7c   : > { %1424 = vrot.lane.b32.xlu0 %v3348_v20, %s3018_s12 }
  0x7f   : > { %1712 = vrot.lane.b32.xlu1 %v1641_v7, %s3019_s13  ;;  %v1551_v7 = vrot.slane %v1549_v44, 1 }
  0x80   : > { %1696 = vrot.lane.b32.xlu0 %v1545_v56, %s3019_s13  ;;  %v3458_v56 = vld [vmem:[%s3079_s26 + $0xa4] ss:$0 sps:$4 sm:$0x11]  }
  0x81   : > { %v1552_v14 = vor.u32 %v1551_v7, %v1547_v2  ;;  %v733_v23 = vshll.u32 %v3458_v56, 16  ;;  %v834_v7 = vrot.slane %v3458_v56, 1 }
  0x83   : > { %785 = vrot.lane.b32.xlu1 %v724_v13, %s3016_s10  ;;  %v1648_v13 = vor.u32 %v1647_v63, %v1643_v62  ;;  %v735_v52 = vrot.slane %v733_v23, 1  ;;  %v3488_v62 = vld [vmem:[%s3079_s26 + $0xa8] sm:$0xff]  }
  0x84   : > { %769 = vrot.lane.b32.xlu0 %v628_v15, %s3016_s10  ;;  %v1556_v15 = vrot.slane %v1554_v8, 1  ;;  %v3491_v63 = vld [vmem:[%s3079_s26 + $0x48] sm:$0xff]   ;;  %v809_v8 = vrot.slane %v3448_v59, 1  ;;  %v1193_v56 = vshll.u32 %v3488_v62, 16 }
  0x85   : > { %v3410_v21 = vpop.permute.xlu1 %970 }
  0x86   : > { %v3412_v22 = vpop.permute.xlu0 %954  ;;  %v1557_v49 = vsel %vm568_vm1, %v1552_v14, %v1556_v15 }
  0x87   : > { %866 = vrot.lane.b32.xlu1 %v832_v27, %s3015_s9 }
  0x88   : > { %850 = vrot.lane.b32.xlu0 %v808_v32, %s3015_s9 }
  0x89   : > { %v843_v45 = vpop.permute.xlu1 %842 }
  0x8a   : > { %v3431_v39 = vpop.permute.xlu0 %1306 }
  0x8b   : > { %978 = vrot.lane.b32.xlu1 %v3389_v6, %s3013_s29  ;;  %v1093_v6 = vsel %vm568_vm1, %v1088_v46, %v1092_v40  ;;  %v1653_v46 = vsel %vm568_vm1, %v1648_v13, %v1652_v0  ;;  %v1735_v0 = vrot.slane %v3435_v43, 1 }
  0x8c   : > { %962 = vrot.lane.b32.xlu0 %v3396_v10, %s3013_s29  ;;  %v632_v10 = vshll.u32 %v3448_v59, 16 }
  0x8d   : > { %v859_v4 = vpop.permute.xlu1 %858  ;;  %v3532_v43 = vsel %vm793_vm0, %v1734_v54, %v1735_v0 }
  0x8e   : > { %v762_v41 = vpop.permute.xlu0 %761  ;;  %v634_v33 = vrot.slane %v632_v10, 1  ;;  %v810_v10 = vrot.slane %v3463_v9, 1  ;;  %v3515_v9 = vld [vmem:[%s3079_s26 + $0xb0] ss:$0 sps:$4 sm:$0x11]  }
  0x8f   : > { %1250 = vrot.lane.b32.xlu1 %v1189_v51, %s3017_s11  ;;  %v1772_v27 = vsel %vm1770_vm2, %v2978_v26, %v762_v41  ;;  %v731_v51 = vor.u32 %v730_v19, %v726_v18  ;;  %v3524_v18 = vld [vmem:[%s3079_s26 + $0x50] ss:$0 sps:$4 sm:$0x11]   ;;  %v1759_v19 = vrot.slane %v3428_v38, 1 }
  0x90   : > { %1234 = vrot.lane.b32.xlu0 %v1093_v6, %s3017_s11  ;;  %v1805_v40 = vsel %vm1803_vm3, %v1772_v27, %v843_v45  ;;  %v635_v55 = vor.u32 %v634_v33, %v630_v25  ;;  %v1725_v45 = vrot.slane %v3186_v53, 1  ;;  %v1749_v53 = vrot.slane %v3181_v47, 1 }
  0x91   : > { %v1323_v12 = vpop.permute.xlu1 %1322  ;;  %v1191_v27 = vshrl.u32 %v3488_v62, 16  ;;  %v811_v34 = vsel %vm793_vm0, %v809_v8, %v810_v10 }
  0x92   : > { %v778_v16 = vpop.permute.xlu0 %777  ;;  %v1727_v47 = vsel %vm793_vm0, %v1725_v45, %v1726_v1 }
  0x93   : > { %v1788_v32 = vsel %vm1770_vm2, %v2979_v28, %v778_v16  ;;  %1330 = vrot.lane.b32.xlu1 %v1296_v48, %s3014_s6  ;;  %v640_v48 = vsel %vm568_vm1, %v635_v55, %v639_v57  ;;  %v1195_v28 = vrot.slane %v1193_v56, 1 }
  0x94   : > { %v1821_v35 = vsel %vm1803_vm3, %v1788_v32, %v859_v4  ;;  %1314 = vrot.lane.b32.xlu0 %v1272_v11, %s3014_s6  ;;  %v1838_v4 = vsel %vm1836_vm4, %v1805_v40, %v3412_v22  ;;  %v736_v22 = vsel %vm568_vm1, %v731_v51, %v735_v52  ;;  %v1097_v11 = vshll.u32 %v3491_v63, 16 }
  0x95   : > { %v1243_v37 = vpop.permute.xlu1 %1242  ;;  %v1854_v42 = vsel %vm1836_vm4, %v1821_v35, %v3410_v21  ;;  %v833_v21 = vrot.slane %v3440_v50, 1  ;;  %v1198_v32 = vshll.u32 %v3515_v9, 16  ;;  %v1095_v35 = vshrl.u32 %v3491_v63, 16 }
  0x96   : > { %v1227_v44 = vpop.permute.xlu0 %1226  ;;  %v1887_v2 = vsel %vm1869_vm5, %v1854_v42, %v1243_v37  ;;  %v1099_v37 = vrot.slane %v1097_v11, 1  ;;  %v1102_v40 = vshll.u32 %v3524_v18, 16 }
  0x97   : > { %1442 = vrot.lane.b32.xlu1 %v3419_v29, %s3018_s12  ;;  %v1871_v41 = vsel %vm1869_vm5, %v1838_v4, %v1227_v44  ;;  %v1920_v13 = vsel %vm1902_vm6, %v1887_v2, %v1323_v12  ;;  %v1758_v12 = vrot.slane %v3419_v29, 1  ;;  %v835_v38 = vsel %vm793_vm0, %v833_v21, %v834_v7  ;;  %v3553_v44 = vld [vmem:[%s3079_s26 + $0xb4] sm:$0xff]   ;;  %v3563_v21 = vld [vmem:[%s3079_s26 + $0xbc] ss:$0 sps:$4 sm:$0x11]   ;;  %v3574_v7 = vld [vmem:[%s3079_s26 + $0xa8] sm:$0xff]  }
  0x98   : > { %1426 = vrot.lane.b32.xlu0 %v3422_v31, %s3018_s12  ;;  %v1904_v15 = vsel %vm1902_vm6, %v1871_v41, %v3431_v39  ;;  %v1751_v31 = vsel %vm793_vm0, %v1749_v53, %v1750_v58  ;;  %v1200_v51 = vrot.slane %v1198_v32, 1  ;;  %v1100_v55 = vor.u32 %v1099_v37, %v1095_v35  ;;  %v2953_v2 = vld [vmem:[%s3079_s26 + $0x5c] ss:$0 sps:$4 sm:$0x11]  }
  0x99   : > { %v1435_v6 = vpop.permute.xlu1 %1434  ;;  %v3537_v29 = vsel %vm793_vm0, %v1758_v12, %v1759_v19  ;;  %v1104_v57 = vrot.slane %v1102_v40, 1  ;;  %v1657_v1 = vshll.u32 %v3553_v44, 16  ;;  %v1297_v4 = vrot.slane %v3488_v62, 1 }
  0x9a   : > { %v1419_v36 = vpop.permute.xlu0 %1418  ;;  %v1953_v14 = vsel %vm1935_vm7, %v1920_v13, %v1435_v6  ;;  %v1298_v41 = vrot.slane %v3515_v9, 1  ;;  %v1738_v53 = vrot.slane %v2953_v2, 1  ;;  %v1655_v56 = vshrl.u32 %v3553_v44, 16 }
  0x9b   : > { %1714 = vrot.lane.b32.xlu1 %v1653_v46, %s3019_s13  ;;  %v1937_v23 = vsel %vm1935_vm7, %v1904_v15, %v1419_v36  ;;  %v3557_v46 = vld [vmem:[%s3079_s26 + $0x54] sm:$0xff]   ;;  %v3581_v36 = vld [vmem:[%s3079_s26 + $0x48] sm:$0xff]   ;;  %v1659_v13 = vrot.slane %v1657_v1, 1  ;;  %v1662_v9 = vshll.u32 %v3563_v21, 16  ;;  %v836_v1 = vrot.slane %v3574_v7, 1 }
  0x9c   : > { %1698 = vrot.lane.b32.xlu0 %v1557_v49, %s3019_s13  ;;  %v1196_v49 = vor.u32 %v1195_v28, %v1191_v27  ;;  %v1561_v6 = vshll.u32 %v3557_v46, 16  ;;  %v1737_v10 = vrot.slane %v3557_v46, 1  ;;  %v3595_v15 = vld [vmem:[%s3079_s26 + $0xb0] ss:$0 sps:$4 sm:$0x11]   ;;  %v644_v12 = vshll.u32 %v3581_v36, 16 }
  0x9d   : > { %v1707_v16 = vpop.permute.xlu1 %1706  ;;  %v738_v27 = vshrl.u32 %v3574_v7, 16  ;;  %v745_v32 = vshll.u32 %v3595_v15, 16 }
  0x9e   : > { %v1691_v25 = vpop.permute.xlu0 %1690  ;;  %v1994_v26 = vsel %vm1968_vm8, %v1953_v14, %v1707_v16  ;;  %v1201_v8 = vsel %vm568_vm1, %v1196_v49, %v1200_v51  ;;  %v3591_v54 = vsel %vm793_vm0, %v1737_v10, %v1738_v53  ;;  %v1563_v0 = vrot.slane %v1561_v6, 1  ;;  %v3623_v53 = vld [vmem:[%s3079_s26 + $0xb4] sm:$0xff]  }
  0x9f   : > { %787 = vrot.lane.b32.xlu1 %v736_v22, %s3016_s10  ;;  %v1970_v39 = vsel %vm1968_vm8, %v1937_v23, %v1691_v25  ;;  %2234 = vmatmul.mubr.bf16.vlgmr.msra.gmra.mrb[0].mxu1 %v1994_v26  ;;  %v1273_v22 = vrot.slane %v3491_v63, 1  ;;  %v1566_v14 = vshll.u32 %v2953_v2, 16  ;;  %v1299_v16 = vsel %vm793_vm0, %v1297_v4, %v1298_v41  ;;  %v2980_v4 = vld [vmem:[%s3079_s26 + $0x6c] sm:$0xff]  }
  0xa0   : > { %771 = vrot.lane.b32.xlu0 %v640_v48, %s3016_s10  ;;  %2170 = vmatmul.mubr.bf16.vlgmr.msra.gmra.mrb[0].mxu0 %v1970_v39  ;;  %v1274_v48 = vrot.slane %v3524_v18, 1  ;;  %v3601_v18 = vld [vmem:[%s3079_s26 + $0x50] ss:$0 sps:$4 sm:$0x11]   ;;  %v1660_v26 = vor.u32 %v1659_v13, %v1655_v56  ;;  %v646_v35 = vrot.slane %v644_v12, 1  ;;  %v837_v2 = vrot.slane %v3595_v15, 1 }
  0xa1   : > { %v3543_v33 = vpop.permute.xlu1 %779  ;;  %2802 = vmatprep.mubr.msk.bf16.mxu0 %vm1770_vm2, %v1727_v47  ;;  %2810 = vmatprep.mubr.msk.bf16.mxu1 %vm1770_vm2, %v1751_v31  ;;  %v1559_v47 = vshrl.u32 %v3557_v46, 16  ;;  %v1664_v31 = vrot.slane %v1662_v9, 1  ;;  %v649_v37 = vshll.u32 %v3601_v18, 16  ;;  %v3631_v13 = vld [vmem:[%s3079_s26 + $0x54] sm:$0xff]  }
  0xa2   : > { %v3550_v42 = vpop.permute.xlu0 %763  ;;  %v1275_v23 = vsel %vm793_vm0, %v1273_v22, %v1274_v48  ;;  %v1790_v6 = vsel %vm1770_vm2, %v2980_v4, %v3543_v33  ;;  %v1728_v33 = vrot.slane %v3237_v61, 1  ;;  %v812_v61 = vrot.slane %v3581_v36, 1 }
  0xa3   : > { %868 = vrot.lane.b32.xlu1 %v835_v38, %s3015_s9  ;;  %v1564_v39 = vor.u32 %v1563_v0, %v1559_v47  ;;  %v1568_v38 = vrot.slane %v1566_v14, 1  ;;  %v1665_v51 = vsel %vm568_vm1, %v1660_v26, %v1664_v31  ;;  %v651_v10 = vrot.slane %v649_v37, 1 }
  0xa4   : > { %852 = vrot.lane.b32.xlu0 %v811_v34, %s3015_s9  ;;  %v642_v34 = vshrl.u32 %v3581_v36, 16  ;;  %v1752_v14 = vrot.slane %v3233_v60, 1 }
  0xa5   : > { %v3560_v52 = vpop.permute.xlu1 %860 }
  0xa6   : > { %v3565_v45 = vpop.permute.xlu0 %844  ;;  %v647_v41 = vor.u32 %v646_v35, %v642_v34  ;;  %v1823_v48 = vsel %vm1803_vm3, %v1790_v6, %v3560_v52 }
  0xa7   : > { %980 = vrot.lane.b32.xlu1 %v3488_v62, %s3013_s29  ;;  %v1105_v62 = vsel %vm568_vm1, %v1100_v55, %v1104_v57  ;;  %v1569_v55 = vsel %vm568_vm1, %v1564_v39, %v1568_v38 }
  0xa8   : > { %964 = vrot.lane.b32.xlu0 %v3491_v63, %s3013_s29  ;;  %v740_v63 = vshll.u32 %v3574_v7, 16 }
  0xa9   : > { %v973_v58 = vpop.permute.xlu1 %972 }
  0xaa   : > { %v957_v11 = vpop.permute.xlu0 %956  ;;  %v742_v28 = vrot.slane %v740_v63, 1  ;;  %v1856_v47 = vsel %vm1836_vm4, %v1823_v48, %v973_v58 }
  0xab   : > { %1252 = vrot.lane.b32.xlu1 %v1201_v8, %s3017_s11  ;;  %v747_v8 = vrot.slane %v745_v32, 1  ;;  %v1203_v32 = vshrl.u32 %v3623_v53, 16 }
  0xac   : > { %1236 = vrot.lane.b32.xlu0 %v1105_v62, %s3017_s11  ;;  %v743_v57 = vor.u32 %v742_v28, %v738_v27  ;;  %v2981_v62 = vld [vmem:[%s3079_s26 + $0xc] sm:$0xff]   ;;  %v838_v28 = vsel %vm793_vm0, %v836_v1, %v837_v2  ;;  %v3680_v1 = vld [vmem:[%s3079_s26 + $0xc0] sm:$0xff]  }
  0xad   : > { %v1245_v19 = vpop.permute.xlu1 %1244  ;;  %v1774_v22 = vsel %vm1770_vm2, %v2981_v62, %v3550_v42  ;;  %v1753_v42 = vrot.slane %v3241_v3, 1  ;;  %v3650_v3 = vld [vmem:[%s3079_s26 + $0xbc] ss:$0 sps:$4 sm:$0x11]   ;;  %v3684_v2 = vld [vmem:[%s3079_s26 + $0x60] sm:$0xff]   ;;  %v1669_v48 = vshll.u32 %v3680_v1, 16 }
  0xae   : > { %v1229_v25 = vpop.permute.xlu0 %1228  ;;  %v1807_v9 = vsel %vm1803_vm3, %v1774_v22, %v3565_v45  ;;  %v1889_v15 = vsel %vm1869_vm5, %v1856_v47, %v1245_v19  ;;  %v748_v60 = vsel %vm568_vm1, %v743_v57, %v747_v8  ;;  %v652_v19 = vsel %vm568_vm1, %v647_v41, %v651_v10  ;;  %v3692_v22 = vld [vmem:[%s3079_s26 + $0xc8] ss:$0 sps:$4 sm:$0x11]  }
  0xaf   : > { %1332 = vrot.lane.b32.xlu1 %v1299_v16, %s3014_s6  ;;  %v1840_v52 = vsel %vm1836_vm4, %v1807_v9, %v957_v11  ;;  %v1205_v11 = vshll.u32 %v3623_v53, 16  ;;  %v1754_v38 = vsel %vm793_vm0, %v1752_v14, %v1753_v42  ;;  %v1210_v35 = vshll.u32 %v3650_v3, 16  ;;  %v3710_v14 = vld [vmem:[%s3079_s26 + $0x54] sm:$0xff]  }
  0xb0   : > { %1316 = vrot.lane.b32.xlu0 %v1275_v23, %s3014_s6  ;;  %v1873_v45 = vsel %vm1869_vm5, %v1840_v52, %v1229_v25  ;;  %v1109_v23 = vshll.u32 %v3631_v13, 16  ;;  %v1300_v47 = vrot.slane %v3623_v53, 1 }
  0xb1   : > { %v1325_v40 = vpop.permute.xlu1 %1324  ;;  %v1207_v34 = vrot.slane %v1205_v11, 1  ;;  %v1212_v6 = vrot.slane %v1210_v35, 1 }
  0xb2   : > { %v1309_v49 = vpop.permute.xlu0 %1308  ;;  %v1922_v58 = vsel %vm1902_vm6, %v1889_v15, %v1325_v40  ;;  %v1276_v15 = vrot.slane %v3631_v13, 1 }
  0xb3   : > { %1444 = vrot.lane.b32.xlu1 %v3553_v44, %s3018_s12  ;;  %v1906_v63 = vsel %vm1902_vm6, %v1873_v45, %v1309_v49  ;;  %v1107_v49 = vshrl.u32 %v3631_v13, 16  ;;  %v1208_v4 = vor.u32 %v1207_v34, %v1203_v32  ;;  %v1667_v45 = vshrl.u32 %v3680_v1, 16 }
  0xb4   : > { %1428 = vrot.lane.b32.xlu0 %v3557_v46, %s3018_s12  ;;  %v1729_v46 = vrot.slane %v3246_v5, 1  ;;  %v813_v5 = vrot.slane %v3601_v18, 1  ;;  %v3657_v18 = vld [vmem:[%s3079_s26 + $0x5c] ss:$0 sps:$4 sm:$0x11]   ;;  %v654_v34 = vshrl.u32 %v3710_v14, 16 }
  0xb5   : > { %v1437_v56 = vpop.permute.xlu1 %1436  ;;  %v1213_v9 = vsel %vm568_vm1, %v1208_v4, %v1212_v6 }
  0xb6   : > { %v1421_v0 = vpop.permute.xlu0 %1420  ;;  %v1955_v16 = vsel %vm1935_vm7, %v1922_v58, %v1437_v56  ;;  %v1730_v39 = vsel %vm793_vm0, %v1728_v33, %v1729_v46  ;;  %v814_v40 = vsel %vm793_vm0, %v812_v61, %v813_v5  ;;  %v3698_v56 = vld [vmem:[%s3079_s26 + $0x68] ss:$0 sps:$4 sm:$0x11]   ;;  %v1573_v33 = vshll.u32 %v3684_v2, 16  ;;  %v3702_v46 = vld [vmem:[%s3079_s26 + $0xb4] sm:$0xff]  }
  0xb7   : > { %1716 = vrot.lane.b32.xlu1 %v1665_v51, %s3019_s13  ;;  %v1939_v25 = vsel %vm1935_vm7, %v1906_v63, %v1421_v0  ;;  %v1111_v51 = vrot.slane %v1109_v23, 1  ;;  %v1301_v0 = vrot.slane %v3650_v3, 1  ;;  %v1277_v61 = vrot.slane %v3657_v18, 1  ;;  %v3721_v63 = vld [vmem:[%s3079_s26 + $0xbc] ss:$0 sps:$4 sm:$0x11]  }
  0xb8   : > { %1700 = vrot.lane.b32.xlu0 %v1569_v55, %s3019_s13  ;;  %v1114_v55 = vshll.u32 %v3657_v18, 16  ;;  %v1671_v58 = vrot.slane %v1669_v48, 1  ;;  %v1575_v3 = vrot.slane %v1573_v33, 1  ;;  %v1578_v11 = vshll.u32 %v3698_v56, 16  ;;  %v2982_v48 = vld [vmem:[%s3079_s26 + $0x78] sm:$0xff]  }
  0xb9   : > { %v1709_v12 = vpop.permute.xlu1 %1708  ;;  %v1112_v41 = vor.u32 %v1111_v51, %v1107_v49  ;;  %v1278_v23 = vsel %vm793_vm0, %v1276_v15, %v1277_v61  ;;  %v757_v32 = vshll.u32 %v3721_v63, 16  ;;  %v2983_v15 = vld [vmem:[%s3079_s26 + $0x18] sm:$0xff]  }
  0xba   : > { %v1693_v26 = vpop.permute.xlu0 %1692  ;;  %v1997_v31 = vsel %vm1968_vm8, %v1955_v16, %v1709_v12  ;;  %v1116_v10 = vrot.slane %v1114_v55, 1  ;;  %v752_v16 = vshll.u32 %v3702_v46, 16  ;;  %v3727_v12 = vld [vmem:[%s3079_s26 + $0x5c] ss:$0 sps:$4 sm:$0x11]  }
  0xbb   : > { %789 = vrot.lane.b32.xlu1 %v748_v60, %s3016_s10  ;;  %v1973_v27 = vsel %vm1968_vm8, %v1939_v25, %v1693_v26  ;;  %2242 = vmatmul.mubr.bf16.gmra.mrb[4].mxu1 %v1997_v31  ;;  %v1674_v60 = vshll.u32 %v3692_v22, 16  ;;  %v1672_v26 = vor.u32 %v1671_v58, %v1667_v45 }
  0xbc   : > { %773 = vrot.lane.b32.xlu0 %v652_v19, %s3016_s10  ;;  %2178 = vmatmul.mubr.bf16.gmra.mrb[4].mxu0 %v1973_v27  ;;  %v1117_v52 = vsel %vm568_vm1, %v1112_v41, %v1116_v10  ;;  %v656_v19 = vshll.u32 %v3710_v14, 16  ;;  %v750_v27 = vshrl.u32 %v3702_v46, 16  ;;  %v839_v41 = vrot.slane %v3702_v46, 1 }
  0xbd   : > { %v3670_v37 = vpop.permute.xlu1 %781  ;;  %2803 = vmatprep.mubr.msk.bf16.mxu0 %vm1770_vm2, %v1730_v39  ;;  %2811 = vmatprep.mubr.msk.bf16.mxu1 %vm1770_vm2, %v1754_v38  ;;  %v1676_v31 = vrot.slane %v1674_v60, 1  ;;  %v1580_v38 = vrot.slane %v1578_v11, 1  ;;  %v840_v10 = vrot.slane %v3721_v63, 1  ;;  %v3757_v60 = vld [vmem:[%s3079_s26 + $0x60] sm:$0xff]  }
  0xbe   : > { %v3677_v57 = vpop.permute.xlu0 %765  ;;  %v658_v35 = vrot.slane %v656_v19, 1  ;;  %v1792_v33 = vsel %vm1770_vm2, %v2982_v48, %v3670_v37  ;;  %v1731_v37 = vrot.slane %v3348_v20, 1  ;;  %v815_v20 = vrot.slane %v3710_v14, 1 }
  0xbf   : > { %870 = vrot.lane.b32.xlu1 %v838_v28, %s3015_s9  ;;  %v754_v28 = vrot.slane %v752_v16, 1  ;;  %v1677_v55 = vsel %vm568_vm1, %v1672_v26, %v1676_v31  ;;  %v1776_v61 = vsel %vm1770_vm2, %v2983_v15, %v3677_v57  ;;  %v1755_v16 = vrot.slane %v3344_v17, 1  ;;  %v2973_v31 = vld [vmem:[%s3079_s26 + $0x68] ss:$0 sps:$4 sm:$0x11]  }
  0xc0   : > { %854 = vrot.lane.b32.xlu0 %v814_v40, %s3015_s9  ;;  %v661_v40 = vshll.u32 %v3727_v12, 16  ;;  %v1756_v57 = vrot.slane %v3352_v24, 1  ;;  %v2972_v24 = vld [vmem:[%s3079_s26 + $0xc8] ss:$0 sps:$4 sm:$0x11]   ;;  %v1126_v48 = vshll.u32 %v2973_v31, 16 }
  0xc1   : > { %v3687_v8 = vpop.permute.xlu1 %862  ;;  %v755_v6 = vor.u32 %v754_v28, %v750_v27 }
  0xc2   : > { %v3689_v62 = vpop.permute.xlu0 %846  ;;  %v1825_v45 = vsel %vm1803_vm3, %v1792_v33, %v3687_v8  ;;  %v1757_v28 = vsel %vm793_vm0, %v1755_v16, %v1756_v57  ;;  %v1128_v15 = vrot.slane %v1126_v48, 1  ;;  %v1279_v57 = vrot.slane %v3757_v60, 1 }
  0xc3   : > { %982 = vrot.lane.b32.xlu1 %v3623_v53, %s3013_s29  ;;  %v1571_v53 = vshrl.u32 %v3684_v2, 16 }
  0xc4   : > { %966 = vrot.lane.b32.xlu0 %v3631_v13, %s3013_s29  ;;  %v1302_v13 = vsel %vm793_vm0, %v1300_v47, %v1301_v0  ;;  %v659_v47 = vor.u32 %v658_v35, %v654_v34  ;;  %v663_v0 = vrot.slane %v661_v40, 1  ;;  %v841_v34 = vsel %vm793_vm0, %v839_v41, %v840_v10 }
  0xc5   : > { %v975_v42 = vpop.permute.xlu1 %974  ;;  %v1576_v39 = vor.u32 %v1575_v3, %v1571_v53  ;;  %v1732_v53 = vrot.slane %v3366_v30, 1  ;;  %v1809_v3 = vsel %vm1803_vm3, %v1776_v61, %v3689_v62  ;;  %v816_v30 = vrot.slane %v3727_v12, 1  ;;  %v3801_v61 = vld [vmem:[%s3079_s26 + $0x6c] sm:$0xff]  }
  0xc6   : > { %v959_v5 = vpop.permute.xlu0 %958  ;;  %v1858_v11 = vsel %vm1836_vm4, %v1825_v45, %v975_v42  ;;  %v664_v26 = vsel %vm568_vm1, %v659_v47, %v663_v0  ;;  %v1121_v12 = vshll.u32 %v3757_v60, 16 }
  0xc7   : > { %1254 = vrot.lane.b32.xlu1 %v1213_v9, %s3017_s11  ;;  %v1581_v4 = vsel %vm568_vm1, %v1576_v39, %v1580_v38  ;;  %v759_v9 = vrot.slane %v757_v32, 1  ;;  %v1842_v8 = vsel %vm1836_vm4, %v1809_v3, %v959_v5  ;;  %v1733_v27 = vsel %vm793_vm0, %v1731_v37, %v1732_v53  ;;  %v3810_v3 = vld [vmem:[%s3079_s26 + $0xd4] ss:$0 sps:$4 sm:$0x11]  }
  0xc8   : > { %1238 = vrot.lane.b32.xlu0 %v1117_v52, %s3017_s11  ;;  %v3749_v52 = vld [vmem:[%s3079_s26 + $0xc0] sm:$0xff]   ;;  %v1304_v53 = vrot.slane %v2972_v24, 1 }
  0xc9   : > { %v1247_v18 = vpop.permute.xlu1 %1246  ;;  %v760_v17 = vsel %vm568_vm1, %v755_v6, %v759_v9  ;;  %v1217_v19 = vshll.u32 %v3749_v52, 16  ;;  %v1215_v35 = vshrl.u32 %v3749_v52, 16  ;;  %v1123_v6 = vrot.slane %v1121_v12, 1  ;;  %v3798_v9 = vld [vmem:[%s3079_s26 + $0xcc] sm:$0xff]  }
  0xca   : > { %v1231_v25 = vpop.permute.xlu0 %1230  ;;  %v1303_v37 = vrot.slane %v3749_v52, 1 }
  0xcb   : > { %1334 = vrot.lane.b32.xlu1 %v1302_v13, %s3014_s6  ;;  %v1891_v13 = vsel %vm1869_vm5, %v1858_v11, %v1247_v18  ;;  %v1875_v62 = vsel %vm1869_vm5, %v1842_v8, %v1231_v25  ;;  %v1219_v40 = vrot.slane %v1217_v19, 1  ;;  %v1681_v11 = vshll.u32 %v3798_v9, 16 }
  0xcc   : > { %1318 = vrot.lane.b32.xlu0 %v1278_v23, %s3014_s6  ;;  %v1280_v8 = vrot.slane %v2973_v31, 1  ;;  %v1583_v19 = vshrl.u32 %v3801_v61, 16 }
  0xcd   : > { %v1327_v49 = vpop.permute.xlu1 %1326  ;;  %v1220_v41 = vor.u32 %v1219_v40, %v1215_v35 }
  0xce   : > { %v1311_v51 = vpop.permute.xlu0 %1310  ;;  %v1924_v42 = vsel %vm1902_vm6, %v1891_v13, %v1327_v49  ;;  %v1222_v49 = vshll.u32 %v2972_v24, 16  ;;  %v3816_v13 = vld [vmem:[%s3079_s26 + $0x74] ss:$0 sps:$4 sm:$0x11]  }
  0xcf   : > { %1446 = vrot.lane.b32.xlu1 %v3680_v1, %s3018_s12  ;;  %v1908_v5 = vsel %vm1902_vm6, %v1875_v62, %v1311_v51  ;;  %v1679_v62 = vshrl.u32 %v3798_v9, 16 }
  0xd0   : > { %1430 = vrot.lane.b32.xlu0 %v3684_v2, %s3018_s12  ;;  %v1224_v10 = vrot.slane %v1222_v49, 1 }
  0xd1   : > { %v1439_v58 = vpop.permute.xlu1 %1438 }
  0xd2   : > { %v1423_v63 = vpop.permute.xlu0 %1422  ;;  %v1957_v18 = vsel %vm1935_vm7, %v1924_v42, %v1439_v58  ;;  %v1225_v58 = vsel %vm568_vm1, %v1220_v41, %v1224_v10  ;;  %v1683_v42 = vrot.slane %v1681_v11, 1 }
  0xd3   : > { %1718 = vrot.lane.b32.xlu1 %v1677_v55, %s3019_s13  ;;  %v1941_v25 = vsel %vm1935_vm7, %v1908_v5, %v1423_v63  ;;  %v817_v55 = vsel %vm793_vm0, %v815_v20, %v816_v30  ;;  %v1585_v20 = vshll.u32 %v3801_v61, 16 }
  0xd4   : > { %1702 = vrot.lane.b32.xlu0 %v1581_v4, %s3019_s13  ;;  %v1119_v4 = vshrl.u32 %v3757_v60, 16 }
  0xd5   : > { %v1711_v23 = vpop.permute.xlu1 %1710  ;;  %v1587_v5 = vrot.slane %v1585_v20, 1 }
  0xd6   : > { %v1695_v39 = vpop.permute.xlu0 %1694  ;;  %v2000_v38 = vsel %vm1968_vm8, %v1957_v18, %v1711_v23  ;;  %v1124_v0 = vor.u32 %v1123_v6, %v1119_v4  ;;  %v1590_v18 = vshll.u32 %v3816_v13, 16 }
  0xd7   : > { %791 = vrot.lane.b32.xlu1 %v760_v17, %s3016_s10  ;;  %v1976_v32 = vsel %vm1968_vm8, %v1941_v25, %v1695_v39  ;;  %2250 = vmatmul.mubr.bf16.gmra.mrb[8].mxu1 %v2000_v38  ;;  %v1686_v17 = vshll.u32 %v3810_v3, 16  ;;  %v1588_v25 = vor.u32 %v1587_v5, %v1583_v19 }
  0xd8   : > { %775 = vrot.lane.b32.xlu0 %v664_v26, %s3016_s10  ;;  %2186 = vmatmul.mubr.bf16.gmra.mrb[8].mxu0 %v1976_v32  ;;  %v1129_v16 = vsel %vm568_vm1, %v1124_v0, %v1128_v15  ;;  %v1684_v26 = vor.u32 %v1683_v42, %v1679_v62  ;;  %v1592_v39 = vrot.slane %v1590_v18, 1  ;;  %v1762_v18 = vrot.slane %v3563_v21, 1 }
  0xd9   : > { %v784_v51 = vpop.permute.xlu1 %783  ;;  %2804 = vmatprep.mubr.msk.bf16.mxu0 %vm1770_vm2, %v1733_v27  ;;  %2812 = vmatprep.mubr.msk.bf16.mxu1 %vm1770_vm2, %v1757_v28  ;;  %v1688_v31 = vrot.slane %v1686_v17, 1  ;;  %v2984_v27 = vld [vmem:[%s3079_s26 + $0x84] sm:$0xff]   ;;  %v2986_v17 = vld [vmem:[%s3079_s26 + $0x90] sm:$0xff]  }
  0xda   : > { %v768_v33 = vpop.permute.xlu0 %767  ;;  %v1794_v28 = vsel %vm1770_vm2, %v2984_v27, %v784_v51 }
  0xdb   : > { %872 = vrot.lane.b32.xlu1 %v841_v34, %s3015_s9  ;;  %v1689_v32 = vsel %vm568_vm1, %v1684_v26, %v1688_v31  ;;  %v2985_v34 = vld [vmem:[%s3079_s26 + $0x24] sm:$0xff]  }
  0xdc   : > { %856 = vrot.lane.b32.xlu0 %v817_v55, %s3015_s9  ;;  %v1778_v35 = vsel %vm1770_vm2, %v2985_v34, %v768_v33  ;;  %v1593_v55 = vsel %vm568_vm1, %v1588_v25, %v1592_v39 }
  0xdd   : > { %v865_v47 = vpop.permute.xlu1 %864 }
  0xde   : > { %v849_v45 = vpop.permute.xlu0 %848  ;;  %v1827_v40 = vsel %vm1803_vm3, %v1794_v28, %v865_v47 }
  0xdf   : > { %984 = vrot.lane.b32.xlu1 %v3749_v52, %s3013_s29  ;;  %v1305_v52 = vsel %vm793_vm0, %v1303_v37, %v1304_v53  ;;  %v1811_v4 = vsel %vm1803_vm3, %v1778_v35, %v849_v45 }
  0xe0   : > { %968 = vrot.lane.b32.xlu0 %v3757_v60, %s3013_s29  ;;  %v1281_v60 = vsel %vm793_vm0, %v1279_v57, %v1280_v8 }
  0xe1   : > { %v977_v63 = vpop.permute.xlu1 %976 }
  0xe2   : > { %v961_v30 = vpop.permute.xlu0 %960  ;;  %v1860_v6 = vsel %vm1836_vm4, %v1827_v40, %v977_v63 }
  0xe3   : > { %1256 = vrot.lane.b32.xlu1 %v1225_v58, %s3017_s11  ;;  %v1844_v51 = vsel %vm1836_vm4, %v1811_v4, %v961_v30 }
  0xe4   : > { %1240 = vrot.lane.b32.xlu0 %v1129_v16, %s3017_s11 }
  0xe5   : > { %v1249_v24 = vpop.permute.xlu1 %1248 }
  0xe6   : > { %v1233_v23 = vpop.permute.xlu0 %1232  ;;  %v1893_v41 = vsel %vm1869_vm5, %v1860_v6, %v1249_v24 }
  0xe7   : > { %1336 = vrot.lane.b32.xlu1 %v1305_v52, %s3014_s6  ;;  %v1877_v10 = vsel %vm1869_vm5, %v1844_v51, %v1233_v23 }
  0xe8   : > { %1320 = vrot.lane.b32.xlu0 %v1281_v60, %s3014_s6  ;;  %v2987_v60 = vld [vmem:[%s3079_s26 + $0x30] sm:$0xff]  }
  0xe9   : > { %v1329_v12 = vpop.permute.xlu1 %1328 }
  0xea   : > { %v1313_v38 = vpop.permute.xlu0 %1312  ;;  %v1926_v33 = vsel %vm1902_vm6, %v1893_v41, %v1329_v12 }
  0xeb   : > { %1448 = vrot.lane.b32.xlu1 %v3798_v9, %s3018_s12  ;;  %v1910_v47 = vsel %vm1902_vm6, %v1877_v10, %v1313_v38 }
  0xec   : > { %1432 = vrot.lane.b32.xlu0 %v3801_v61, %s3018_s12 }
  0xed   : > { %v1441_v49 = vpop.permute.xlu1 %1440 }
  0xee   : > { %v1425_v48 = vpop.permute.xlu0 %1424  ;;  %v1959_v0 = vsel %vm1935_vm7, %v1926_v33, %v1441_v49 }
  0xef   : > { %1720 = vrot.lane.b32.xlu1 %v1689_v32, %s3019_s13  ;;  %v1943_v45 = vsel %vm1935_vm7, %v1910_v47, %v1425_v48 }
  0xf0   : > { %1704 = vrot.lane.b32.xlu0 %v1593_v55, %s3019_s13 }
  0xf1   : > { %v1713_v15 = vpop.permute.xlu1 %1712 }
  0xf2   : > { %v1697_v58 = vpop.permute.xlu0 %1696  ;;  %v2003_v37 = vsel %vm1968_vm8, %v1959_v0, %v1713_v15 }
  0xf3   : > { %v1979_v53 = vsel %vm1968_vm8, %v1943_v45, %v1697_v58  ;;  %2258 = vmatmul.mubr.bf16.gmra.mrb[12].mxu1 %v2003_v37  ;;  %v1765_v37 = vrot.slane %v3692_v22, 1 }
  0xf4   : > { %2194 = vmatmul.mubr.bf16.gmra.mrb[12].mxu0 %v1979_v53  ;;  %2813 = vmatprep.mubr.msk.bf16.mxu1 %vm1770_vm2, %v3537_v29 }
  0xf5   : > { %v786_v11 = vpop.permute.xlu1 %785  ;;  %2805 = vmatprep.mubr.msk.bf16.mxu0 %vm1770_vm2, %v3532_v43  ;;  %v1761_v43 = vrot.slane %v3553_v44, 1 }
  0xf6   : > { %v770_v63 = vpop.permute.xlu0 %769  ;;  %v1796_v24 = vsel %vm1770_vm2, %v2986_v17, %v786_v11 }
  0xf7   : > { %v1780_v19 = vsel %vm1770_vm2, %v2987_v60, %v770_v63  ;;  %v1763_v21 = vsel %vm793_vm0, %v1761_v43, %v1762_v18 }
  0xf9   : > { %v867_v16 = vpop.permute.xlu1 %866 }
  0xfa   : > { %v851_v57 = vpop.permute.xlu0 %850  ;;  %v1829_v29 = vsel %vm1803_vm3, %v1796_v24, %v867_v16  ;;  %v1740_v16 = vrot.slane %v3684_v2, 1 }
  0xfb   : > { %v1813_v23 = vsel %vm1803_vm3, %v1780_v19, %v851_v57  ;;  %v1741_v57 = vrot.slane %v3698_v56, 1 }
  0xfd   : > { %v979_v8 = vpop.permute.xlu1 %978 }
  0xfe   : > { %v963_v20 = vpop.permute.xlu0 %962  ;;  %v1862_v26 = vsel %vm1836_vm4, %v1829_v29, %v979_v8 }
  0xff   : > { %v1846_v12 = vsel %vm1836_vm4, %v1813_v23, %v963_v20 }
 0x101   : > { %v1251_v30 = vpop.permute.xlu1 %1250 }
 0x102   : > { %v1235_v52 = vpop.permute.xlu0 %1234  ;;  %v1895_v25 = vsel %vm1869_vm5, %v1862_v26, %v1251_v30 }
 0x103   : > { %v1879_v39 = vsel %vm1869_vm5, %v1846_v12, %v1235_v52 }
 0x105   : > { %v1331_v62 = vpop.permute.xlu1 %1330 }
 0x106   : > { %v1315_v42 = vpop.permute.xlu0 %1314  ;;  %v1928_v38 = vsel %vm1902_vm6, %v1895_v25, %v1331_v62 }
 0x107   : > { %v1912_v27 = vsel %vm1902_vm6, %v1879_v39, %v1315_v42  ;;  %v1742_v42 = vsel %vm793_vm0, %v1740_v16, %v1741_v57 }
 0x109   : > { %v1443_v5 = vpop.permute.xlu1 %1442 }
 0x10a   : > { %v1427_v31 = vpop.permute.xlu0 %1426  ;;  %v1961_v28 = vsel %vm1935_vm7, %v1928_v38, %v1443_v5 }
 0x10b   : > { %v1945_v32 = vsel %vm1935_vm7, %v1912_v27, %v1427_v31  ;;  %v1767_v27 = vrot.slane %v3798_v9, 1 }
 0x10d   : > { %v1715_v44 = vpop.permute.xlu1 %1714 }
 0x10e   : > { %v1699_v34 = vpop.permute.xlu0 %1698  ;;  %v2006_v35 = vsel %vm1968_vm8, %v1961_v28, %v1715_v44  ;;  %v1768_v28 = vrot.slane %v3810_v3, 1 }
 0x10f   : > { %v1982_v40 = vsel %vm1968_vm8, %v1945_v32, %v1699_v34  ;;  %2266 = vmatmul.mubr.bf16.gmra.mrb[16].mxu1 %v2006_v35  ;;  %v1743_v34 = vrot.slane %v3801_v61, 1  ;;  %v1744_v35 = vrot.slane %v3816_v13, 1 }
 0x110   : > { %2202 = vmatmul.mubr.bf16.gmra.mrb[16].mxu0 %v1982_v40  ;;  %2814 = vmatprep.mubr.msk.bf16.mxu1 %vm1770_vm2, %v1763_v21 }
 0x111   : > { %v788_v49 = vpop.permute.xlu1 %787  ;;  %2806 = vmatprep.mubr.msk.bf16.mxu0 %vm1770_vm2, %v3591_v54  ;;  %v1764_v54 = vrot.slane %v3680_v1, 1 }
 0x112   : > { %v772_v55 = vpop.permute.xlu0 %771  ;;  %v1798_v0 = vsel %vm1770_vm2, %v3440_v50, %v788_v49 }
 0x113   : > { %v1782_v15 = vsel %vm1770_vm2, %v3448_v59, %v772_v55  ;;  %v1766_v52 = vsel %vm793_vm0, %v1764_v54, %v1765_v37 }
 0x115   : > { %v869_v4 = vpop.permute.xlu1 %868 }
 0x116   : > { %v853_v6 = vpop.permute.xlu0 %852  ;;  %v1831_v45 = vsel %vm1803_vm3, %v1798_v0, %v869_v4  ;;  %v1769_v4 = vsel %vm793_vm0, %v1767_v27, %v1768_v28 }
 0x117   : > { %v1815_v53 = vsel %vm1803_vm3, %v1782_v15, %v853_v6 }
 0x119   : > { %v981_v48 = vpop.permute.xlu1 %980 }
 0x11a   : > { %v965_v51 = vpop.permute.xlu0 %964  ;;  %v1864_v11 = vsel %vm1836_vm4, %v1831_v45, %v981_v48  ;;  %v1745_v48 = vsel %vm793_vm0, %v1743_v34, %v1744_v35 }
 0x11b   : > { %v1848_v50 = vsel %vm1836_vm4, %v1815_v53, %v965_v51 }
 0x11d   : > { %v1253_v41 = vpop.permute.xlu1 %1252 }
 0x11e   : > { %v1237_v10 = vpop.permute.xlu0 %1236  ;;  %v1897_v59 = vsel %vm1869_vm5, %v1864_v11, %v1253_v41 }
 0x11f   : > { %v1881_v8 = vsel %vm1869_vm5, %v1848_v50, %v1237_v10 }
 0x121   : > { %v1333_v33 = vpop.permute.xlu1 %1332 }
 0x122   : > { %v1317_v47 = vpop.permute.xlu0 %1316  ;;  %v1930_v20 = vsel %vm1902_vm6, %v1897_v59, %v1333_v33 }
 0x123   : > { %v1914_v1 = vsel %vm1902_vm6, %v1881_v8, %v1317_v47 }
 0x125   : > { %v1445_v58 = vpop.permute.xlu1 %1444 }
 0x126   : > { %v1429_v63 = vpop.permute.xlu0 %1428  ;;  %v1963_v22 = vsel %vm1935_vm7, %v1930_v20, %v1445_v58 }
 0x127   : > { %v1947_v62 = vsel %vm1935_vm7, %v1914_v1, %v1429_v63 }
 0x129   : > { %v1717_v30 = vpop.permute.xlu1 %1716 }
 0x12a   : > { %v1701_v2 = vpop.permute.xlu0 %1700  ;;  %v2009_v56 = vsel %vm1968_vm8, %v1963_v22, %v1717_v30 }
 0x12b   : > { %v1985_v17 = vsel %vm1968_vm8, %v1947_v62, %v1701_v2  ;;  %2274 = vmatmul.mubr.bf16.gmra.mrb[20].mxu1 %v2009_v56 }
 0x12c   : > { %2210 = vmatmul.mubr.bf16.gmra.mrb[20].mxu0 %v1985_v17  ;;  %2815 = vmatprep.mubr.msk.bf16.mxu1 %vm1770_vm2, %v1766_v52  ;;  %v3951_v17 = vld [vmem:[%s4067_s3] ss:$0 sm:$0xff] }
 0x12d   : > { %v790_v24 = vpop.permute.xlu1 %789  ;;  %2807 = vmatprep.mubr.msk.bf16.mxu0 %vm1770_vm2, %v1742_v42  ;;  %v3946_v42 = vld [vmem:[%s4066_s2] ss:$0 sm:$0xff] }
 0x12e   : > { %v774_v60 = vpop.permute.xlu0 %773  ;;  %v1800_v12 = vsel %vm1770_vm2, %v3574_v7, %v790_v24 }
 0x12f   : > { %v1784_v25 = vsel %vm1770_vm2, %v3581_v36, %v774_v60 }
 0x131   : > { %v871_v19 = vpop.permute.xlu1 %870 }
 0x132   : > { %v855_v29 = vpop.permute.xlu0 %854  ;;  %v1833_v39 = vsel %vm1803_vm3, %v1800_v12, %v871_v19 }
 0x133   : > { %v1817_v44 = vsel %vm1803_vm3, %v1784_v25, %v855_v29 }
 0x135   : > { %v983_v5 = vpop.permute.xlu1 %982 }
 0x136   : > { %v967_v43 = vpop.permute.xlu0 %966  ;;  %v1866_v21 = vsel %vm1836_vm4, %v1833_v39, %v983_v5 }
 0x137   : > { %v1850_v7 = vsel %vm1836_vm4, %v1817_v44, %v967_v43 }
 0x139   : > { %v1255_v18 = vpop.permute.xlu1 %1254 }
 0x13a   : > { %v1239_v23 = vpop.permute.xlu0 %1238  ;;  %v1899_v36 = vsel %vm1869_vm5, %v1866_v21, %v1255_v18 }
 0x13b   : > { %v1883_v40 = vsel %vm1869_vm5, %v1850_v7, %v1239_v23 }
 0x13d   : > { %v1335_v26 = vpop.permute.xlu1 %1334 }
 0x13e   : > { %v1319_v31 = vpop.permute.xlu0 %1318  ;;  %v1932_v49 = vsel %vm1902_vm6, %v1899_v36, %v1335_v26 }
 0x13f   : > { %v1916_v9 = vsel %vm1902_vm6, %v1883_v40, %v1319_v31 }
 0x141   : > { %v1447_v38 = vpop.permute.xlu1 %1446 }
 0x142   : > { %v1431_v32 = vpop.permute.xlu0 %1430  ;;  %v1965_v3 = vsel %vm1935_vm7, %v1932_v49, %v1447_v38 }
 0x143   : > { %v1949_v6 = vsel %vm1935_vm7, %v1916_v9, %v1431_v32 }
 0x145   : > { %v1719_v55 = vpop.permute.xlu1 %1718 }
 0x146   : > { %v1703_v61 = vpop.permute.xlu0 %1702  ;;  %v2012_v13 = vsel %vm1968_vm8, %v1965_v3, %v1719_v55 }
 0x147   : > { %v1988_v51 = vsel %vm1968_vm8, %v1949_v6, %v1703_v61  ;;  %2282 = vmatmul.mubr.bf16.gmra.mrb[24].mxu1 %v2012_v13 }
 0x148   : > { %2218 = vmatmul.mubr.bf16.gmra.mrb[24].mxu0 %v1988_v51  ;;  %2816 = vmatprep.mubr.msk.bf16.mxu1 %vm1770_vm2, %v1769_v4 }
 0x149   : > { %v792_v41 = vpop.permute.xlu1 %791  ;;  %2808 = vmatprep.mubr.msk.bf16.mxu0 %vm1770_vm2, %v1745_v48 }
 0x14a   : > { %v776_v10 = vpop.permute.xlu0 %775  ;;  %v1802_v53 = vsel %vm1770_vm2, %v3702_v46, %v792_v41 }
 0x14b   : > { %v1786_v11 = vsel %vm1770_vm2, %v3710_v14, %v776_v10 }
 0x14d   : > { %v873_v33 = vpop.permute.xlu1 %872 }
 0x14e   : > { %v857_v47 = vpop.permute.xlu0 %856  ;;  %v1835_v63 = vsel %vm1803_vm3, %v1802_v53, %v873_v33 }
 0x14f   : > { %v1819_v57 = vsel %vm1803_vm3, %v1786_v11, %v857_v47 }
 0x151   : > { %v985_v0 = vpop.permute.xlu1 %984 }
 0x152   : > { %v969_v15 = vpop.permute.xlu0 %968  ;;  %v1868_v50 = vsel %vm1836_vm4, %v1835_v63, %v985_v0 }
 0x153   : > { %v1852_v8 = vsel %vm1836_vm4, %v1819_v57, %v969_v15 }
 0x155   : > { %v1257_v45 = vpop.permute.xlu1 %1256 }
 0x156   : > { %v1241_v58 = vpop.permute.xlu0 %1240  ;;  %v1901_v20 = vsel %vm1869_vm5, %v1868_v50, %v1257_v45 }
 0x157   : > { %v1885_v1 = vsel %vm1869_vm5, %v1852_v8, %v1241_v58 }
 0x159   : > { %v1337_v54 = vpop.permute.xlu1 %1336 }
 0x15a   : > { %v1321_v37 = vpop.permute.xlu0 %1320  ;;  %v1934_v46 = vsel %vm1902_vm6, %v1901_v20, %v1337_v54 }
 0x15b   : > { %v1918_v22 = vsel %vm1902_vm6, %v1885_v1, %v1321_v37 }
 0x15d   : > { %v1449_v16 = vpop.permute.xlu1 %1448 }
 0x15e   : > { %v1433_v59 = vpop.permute.xlu0 %1432  ;;  %v1967_v14 = vsel %vm1935_vm7, %v1934_v46, %v1449_v16 }
 0x15f   : > { %v1951_v52 = vsel %vm1935_vm7, %v1918_v22, %v1433_v59 }
 0x161   : > { %v1721_v30 = vpop.permute.xlu1 %1720 }
 0x162   : > { %v1705_v62 = vpop.permute.xlu0 %1704  ;;  %v2015_v2 = vsel %vm1968_vm8, %v1967_v14, %v1721_v30 }
 0x163   : > { %v1991_v56 = vsel %vm1968_vm8, %v1951_v52, %v1705_v62  ;;  %2290 = vmatmul.mubr.bf16.gmra.mrb[28].mxu1 %v2015_v2 }
 0x164   : > { %2226 = vmatmul.mubr.bf16.gmra.mrb[28].mxu0 %v1991_v56 }
 0x172   : > { %v2235_v24 = vpop.f32.mrb[0].mxu1 }
 0x173   : > { %v2171_v60 = vpop.f32.mrb[0].mxu0  ;;  %v2321_v19 = vmul.f32 %v3946_v42, %v2235_v24  ;;  %v2237_v29 = vpop.f32.mrb[1].mxu1 }
 0x174   : > { %v2305_v5 = vmul.f32 %v3946_v42, %v2171_v60  ;;  %v2173_v43 = vpop.f32.mrb[1].mxu0  ;;  %v2238_v18 = vpop.f32.mrb[2].mxu1 }
 0x175   : > { %v2360_v23 = vadd.f32 %v3951_v17, %v2321_v19  ;;  %v2174_v26 = vpop.f32.mrb[2].mxu0  ;;  %v2322_v31 = vmul.f32 %v3946_v42, %v2238_v18  ;;  %v2240_v12 = vpop.f32.mrb[3].mxu1 }
 0x176   : > { %v2344_v25 = vadd.f32 %v3951_v17, %v2305_v5  ;;  %v2306_v39 = vmul.f32 %v3946_v42, %v2174_v26  ;;  %v2176_v38 = vpop.f32.mrb[3].mxu0 }
 0x177   : > { %v2392_v27 = vmax.f32 %v2360_v23, 0.0  ;;  %v2361_v28 = vadd.f32 %v3951_v17, %v2322_v31 }
 0x178   : > { %v2376_v44 = vmax.f32 %v2344_v25, 0.0  ;;  %v2345_v21 = vadd.f32 %v3951_v17, %v2306_v39 }
 0x179   : > { %2424 = vst [vmem:[%s3961_s7 + $0x80] sm:$0xff] %v2392_v27  ;;  %v2393_v32 = vmax.f32 %v2361_v28, 0.0 }
 0x17a   : > { %2408 = vst [vmem:[%s3961_s7] sm:$0xff] %v2376_v44  ;;  %v2377_v34 = vmax.f32 %v2345_v21, 0.0 }
 0x17b   : > { %2425 = vst [vmem:[%s3961_s7 + $0x88] sm:$0xff] %v2393_v32 }
 0x17c   : > { %2409 = vst [vmem:[%s3961_s7 + $0x8] sm:$0xff] %v2377_v34 }
 0x18e   : > { %v2243_v35 = vpop.f32.mrb[4].mxu1 }
 0x18f   : > { %v2179_v7 = vpop.f32.mrb[4].mxu0  ;;  %v2323_v36 = vmul.f32 %v3946_v42, %v2243_v35  ;;  %v2245_v40 = vpop.f32.mrb[5].mxu1 }
 0x190   : > { %v2307_v49 = vmul.f32 %v3946_v42, %v2179_v7  ;;  %v2181_v9 = vpop.f32.mrb[5].mxu0  ;;  %v2246_v3 = vpop.f32.mrb[6].mxu1 }
 0x191   : > { %v2362_v55 = vadd.f32 %v3951_v17, %v2323_v36  ;;  %v2182_v4 = vpop.f32.mrb[6].mxu0  ;;  %v2324_v6 = vmul.f32 %v3946_v42, %v2246_v3  ;;  %v2248_v61 = vpop.f32.mrb[7].mxu1 }
 0x192   : > { %v2346_v13 = vadd.f32 %v3951_v17, %v2307_v49  ;;  %v2308_v48 = vmul.f32 %v3946_v42, %v2182_v4  ;;  %v2184_v51 = vpop.f32.mrb[7].mxu0 }
 0x193   : > { %v2394_v41 = vmax.f32 %v2362_v55, 0.0  ;;  %v2363_v10 = vadd.f32 %v3951_v17, %v2324_v6 }
 0x194   : > { %v2378_v33 = vmax.f32 %v2346_v13, 0.0  ;;  %v2347_v47 = vadd.f32 %v3951_v17, %v2308_v48 }
 0x195   : > { %2426 = vst [vmem:[%s3961_s7 + $0x90] sm:$0xff] %v2394_v41  ;;  %v2395_v0 = vmax.f32 %v2363_v10, 0.0 }
 0x196   : > { %2410 = vst [vmem:[%s3961_s7 + $0x10] sm:$0xff] %v2378_v33  ;;  %v2379_v15 = vmax.f32 %v2347_v47, 0.0 }
 0x197   : > { %2427 = vst [vmem:[%s3961_s7 + $0x98] sm:$0xff] %v2395_v0 }
 0x198   : > { %2411 = vst [vmem:[%s3961_s7 + $0x18] sm:$0xff] %v2379_v15 }
 0x1aa   : > { %v2251_v45 = vpop.f32.mrb[8].mxu1 }
 0x1ab   : > { %v2187_v58 = vpop.f32.mrb[8].mxu0  ;;  %v2325_v54 = vmul.f32 %v3946_v42, %v2251_v45  ;;  %v2253_v37 = vpop.f32.mrb[9].mxu1 }
 0x1ac   : > { %v2309_v53 = vmul.f32 %v3946_v42, %v2187_v58  ;;  %v2189_v11 = vpop.f32.mrb[9].mxu0  ;;  %v2254_v63 = vpop.f32.mrb[10].mxu1 }
 0x1ad   : > { %v2364_v16 = vadd.f32 %v3951_v17, %v2325_v54  ;;  %v2190_v57 = vpop.f32.mrb[10].mxu0  ;;  %v2326_v50 = vmul.f32 %v3946_v42, %v2254_v63  ;;  %v2256_v59 = vpop.f32.mrb[11].mxu1 }
 0x1ae   : > { %v2348_v8 = vadd.f32 %v3951_v17, %v2309_v53  ;;  %v2310_v20 = vmul.f32 %v3946_v42, %v2190_v57  ;;  %v2192_v1 = vpop.f32.mrb[11].mxu0 }
 0x1af   : > { %v2396_v46 = vmax.f32 %v2364_v16, 0.0  ;;  %v2365_v22 = vadd.f32 %v3951_v17, %v2326_v50 }
 0x1b0   : > { %v2380_v14 = vmax.f32 %v2348_v8, 0.0  ;;  %v2349_v30 = vadd.f32 %v3951_v17, %v2310_v20 }
 0x1b1   : > { %2428 = vst [vmem:[%s3961_s7 + $0xa0] sm:$0xff] %v2396_v46  ;;  %v2397_v52 = vmax.f32 %v2365_v22, 0.0 }
 0x1b2   : > { %2412 = vst [vmem:[%s3961_s7 + $0x20] sm:$0xff] %v2380_v14  ;;  %v2381_v62 = vmax.f32 %v2349_v30, 0.0 }
 0x1b3   : > { %2429 = vst [vmem:[%s3961_s7 + $0xa8] sm:$0xff] %v2397_v52 }
 0x1b4   : > { %2413 = vst [vmem:[%s3961_s7 + $0x28] sm:$0xff] %v2381_v62 }
 0x1c6   : > { %v2259_v2 = vpop.f32.mrb[12].mxu1 }
 0x1c7   : > { %v2195_v56 = vpop.f32.mrb[12].mxu0  ;;  %v2327_v24 = vmul.f32 %v3946_v42, %v2259_v2  ;;  %v2261_v60 = vpop.f32.mrb[13].mxu1 }
 0x1c8   : > { %v2311_v19 = vmul.f32 %v3946_v42, %v2195_v56  ;;  %v2197_v29 = vpop.f32.mrb[13].mxu0  ;;  %v2262_v5 = vpop.f32.mrb[14].mxu1 }
 0x1c9   : > { %v2366_v43 = vadd.f32 %v3951_v17, %v2327_v24  ;;  %v2198_v18 = vpop.f32.mrb[14].mxu0  ;;  %v2328_v23 = vmul.f32 %v3946_v42, %v2262_v5  ;;  %v2264_v26 = vpop.f32.mrb[15].mxu1 }
 0x1ca   : > { %v2350_v31 = vadd.f32 %v3951_v17, %v2311_v19  ;;  %v2312_v12 = vmul.f32 %v3946_v42, %v2198_v18  ;;  %v2200_v25 = vpop.f32.mrb[15].mxu0 }
 0x1cb   : > { %v2398_v39 = vmax.f32 %v2366_v43, 0.0  ;;  %v2367_v38 = vadd.f32 %v3951_v17, %v2328_v23 }
 0x1cc   : > { %v2382_v27 = vmax.f32 %v2350_v31, 0.0  ;;  %v2351_v28 = vadd.f32 %v3951_v17, %v2312_v12 }
 0x1cd   : > { %2430 = vst [vmem:[%s3961_s7 + $0xb0] sm:$0xff] %v2398_v39  ;;  %v2399_v44 = vmax.f32 %v2367_v38, 0.0 }
 0x1ce   : > { %2414 = vst [vmem:[%s3961_s7 + $0x30] sm:$0xff] %v2382_v27  ;;  %v2383_v21 = vmax.f32 %v2351_v28, 0.0 }
 0x1cf   : > { %2431 = vst [vmem:[%s3961_s7 + $0xb8] sm:$0xff] %v2399_v44 }
 0x1d0   : > { %2415 = vst [vmem:[%s3961_s7 + $0x38] sm:$0xff] %v2383_v21 }
 0x1e2   : > { %v2267_v32 = vpop.f32.mrb[16].mxu1 }
 0x1e3   : > { %v2203_v34 = vpop.f32.mrb[16].mxu0  ;;  %v2329_v35 = vmul.f32 %v3946_v42, %v2267_v32  ;;  %v2269_v7 = vpop.f32.mrb[17].mxu1 }
 0x1e4   : > { %v2313_v36 = vmul.f32 %v3946_v42, %v2203_v34  ;;  %v2205_v40 = vpop.f32.mrb[17].mxu0  ;;  %v2270_v49 = vpop.f32.mrb[18].mxu1 }
 0x1e5   : > { %v2368_v9 = vadd.f32 %v3951_v17, %v2329_v35  ;;  %v2206_v3 = vpop.f32.mrb[18].mxu0  ;;  %v2330_v55 = vmul.f32 %v3946_v42, %v2270_v49  ;;  %v2272_v4 = vpop.f32.mrb[19].mxu1 }
 0x1e6   : > { %v2352_v6 = vadd.f32 %v3951_v17, %v2313_v36  ;;  %v2314_v61 = vmul.f32 %v3946_v42, %v2206_v3  ;;  %v2208_v13 = vpop.f32.mrb[19].mxu0 }
 0x1e7   : > { %v2400_v48 = vmax.f32 %v2368_v9, 0.0  ;;  %v2369_v51 = vadd.f32 %v3951_v17, %v2330_v55 }
 0x1e8   : > { %v2384_v41 = vmax.f32 %v2352_v6, 0.0  ;;  %v2353_v10 = vadd.f32 %v3951_v17, %v2314_v61 }
 0x1e9   : > { %2432 = vst [vmem:[%s3961_s7 + $0xc0] sm:$0xff] %v2400_v48  ;;  %v2401_v33 = vmax.f32 %v2369_v51, 0.0 }
 0x1ea   : > { %2416 = vst [vmem:[%s3961_s7 + $0x40] sm:$0xff] %v2384_v41  ;;  %v2385_v47 = vmax.f32 %v2353_v10, 0.0 }
 0x1eb   : > { %2433 = vst [vmem:[%s3961_s7 + $0xc8] sm:$0xff] %v2401_v33 }
 0x1ec   : > { %2417 = vst [vmem:[%s3961_s7 + $0x48] sm:$0xff] %v2385_v47 }
 0x1fe   : > { %v2275_v0 = vpop.f32.mrb[20].mxu1 }
 0x1ff   : > { %v2211_v15 = vpop.f32.mrb[20].mxu0  ;;  %v2331_v45 = vmul.f32 %v3946_v42, %v2275_v0  ;;  %v2277_v58 = vpop.f32.mrb[21].mxu1 }
 0x200   : > { %v2315_v54 = vmul.f32 %v3946_v42, %v2211_v15  ;;  %v2213_v37 = vpop.f32.mrb[21].mxu0  ;;  %v2278_v53 = vpop.f32.mrb[22].mxu1 }
 0x201   : > { %v2370_v11 = vadd.f32 %v3951_v17, %v2331_v45  ;;  %v2214_v63 = vpop.f32.mrb[22].mxu0  ;;  %v2332_v16 = vmul.f32 %v3946_v42, %v2278_v53  ;;  %v2280_v57 = vpop.f32.mrb[23].mxu1 }
 0x202   : > { %v2354_v50 = vadd.f32 %v3951_v17, %v2315_v54  ;;  %v2316_v59 = vmul.f32 %v3946_v42, %v2214_v63  ;;  %v2216_v8 = vpop.f32.mrb[23].mxu0 }
 0x203   : > { %v2402_v20 = vmax.f32 %v2370_v11, 0.0  ;;  %v2371_v1 = vadd.f32 %v3951_v17, %v2332_v16 }
 0x204   : > { %v2386_v46 = vmax.f32 %v2354_v50, 0.0  ;;  %v2355_v22 = vadd.f32 %v3951_v17, %v2316_v59 }
 0x205   : > { %2434 = vst [vmem:[%s3961_s7 + $0xd0] sm:$0xff] %v2402_v20  ;;  %v2403_v14 = vmax.f32 %v2371_v1, 0.0 }
 0x206   : > { %2418 = vst [vmem:[%s3961_s7 + $0x50] sm:$0xff] %v2386_v46  ;;  %v2387_v30 = vmax.f32 %v2355_v22, 0.0 }
 0x207   : > { %2435 = vst [vmem:[%s3961_s7 + $0xd8] sm:$0xff] %v2403_v14 }
 0x208   : > { %2419 = vst [vmem:[%s3961_s7 + $0x58] sm:$0xff] %v2387_v30 }
 0x21a   : > { %v2283_v52 = vpop.f32.mrb[24].mxu1 }
 0x21b   : > { %v2219_v62 = vpop.f32.mrb[24].mxu0  ;;  %v2333_v2 = vmul.f32 %v3946_v42, %v2283_v52  ;;  %v2285_v56 = vpop.f32.mrb[25].mxu1 }
 0x21c   : > { %v2317_v24 = vmul.f32 %v3946_v42, %v2219_v62  ;;  %v2221_v60 = vpop.f32.mrb[25].mxu0  ;;  %v2286_v19 = vpop.f32.mrb[26].mxu1 }
 0x21d   : > { %v2372_v29 = vadd.f32 %v3951_v17, %v2333_v2  ;;  %v2222_v5 = vpop.f32.mrb[26].mxu0  ;;  %v2334_v43 = vmul.f32 %v3946_v42, %v2286_v19  ;;  %v2288_v18 = vpop.f32.mrb[27].mxu1 }
 0x21e   : > { %v2356_v23 = vadd.f32 %v3951_v17, %v2317_v24  ;;  %v2318_v26 = vmul.f32 %v3946_v42, %v2222_v5  ;;  %v2224_v31 = vpop.f32.mrb[27].mxu0 }
 0x21f   : > { %v2404_v12 = vmax.f32 %v2372_v29, 0.0  ;;  %v2373_v25 = vadd.f32 %v3951_v17, %v2334_v43 }
 0x220   : > { %v2388_v39 = vmax.f32 %v2356_v23, 0.0  ;;  %v2357_v38 = vadd.f32 %v3951_v17, %v2318_v26 }
 0x221   : > { %2436 = vst [vmem:[%s3961_s7 + $0xe0] sm:$0xff] %v2404_v12  ;;  %v2405_v27 = vmax.f32 %v2373_v25, 0.0 }
 0x222   : > { %2420 = vst [vmem:[%s3961_s7 + $0x60] sm:$0xff] %v2388_v39  ;;  %v2389_v28 = vmax.f32 %v2357_v38, 0.0 }
 0x223   : > { %2437 = vst [vmem:[%s3961_s7 + $0xe8] sm:$0xff] %v2405_v27 }
 0x224   : > { %2421 = vst [vmem:[%s3961_s7 + $0x68] sm:$0xff] %v2389_v28 }
 0x236   : > { %v2291_v44 = vpop.f32.mrb[28].mxu1 }
 0x237   : > { %v2227_v21 = vpop.f32.mrb[28].mxu0  ;;  %v2335_v32 = vmul.f32 %v3946_v42, %v2291_v44  ;;  %v2293_v34 = vpop.f32.mrb[29].mxu1 }
 0x238   : > { %v2319_v35 = vmul.f32 %v3946_v42, %v2227_v21  ;;  %v2229_v7 = vpop.f32.mrb[29].mxu0  ;;  %v2294_v36 = vpop.f32.mrb[30].mxu1 }
 0x239   : > { %v2374_v40 = vadd.f32 %v3951_v17, %v2335_v32  ;;  %v2230_v49 = vpop.f32.mrb[30].mxu0  ;;  %v2336_v9 = vmul.f32 %v3946_v42, %v2294_v36  ;;  %v2296_v3 = vpop.f32.mrb[31].mxu1 }
 0x23a   : > { %v2358_v55 = vadd.f32 %v3951_v17, %v2319_v35  ;;  %v2320_v4 = vmul.f32 %v3946_v42, %v2230_v49  ;;  %v2232_v6 = vpop.f32.mrb[31].mxu0 }
 0x23b   : > { %v2406_v61 = vmax.f32 %v2374_v40, 0.0  ;;  %v2375_v13 = vadd.f32 %v3951_v17, %v2336_v9 }
 0x23c   : > { %v2390_v48 = vmax.f32 %v2358_v55, 0.0  ;;  %v2359_v51 = vadd.f32 %v3951_v17, %v2320_v4 }
 0x23d   : > { %2438 = vst [vmem:[%s3961_s7 + $0xf0] sm:$0xff] %v2406_v61  ;;  %v2407_v41 = vmax.f32 %v2375_v13, 0.0 }
 0x23e   : > { %2422 = vst [vmem:[%s3961_s7 + $0x70] sm:$0xff] %v2390_v48  ;;  %v2391_v10 = vmax.f32 %v2359_v51, 0.0 }
 0x23f   : > { %2439 = vst [vmem:[%s3961_s7 + $0xf8] sm:$0xff] %v2407_v41 }
 0x240   : > { %2423 = vst [vmem:[%s3961_s7 + $0x78] sm:$0xff] %v2391_v10 }
 0x241 PF: > { %s14_s17 = sadd.s32 1, %s3010_s17   ;;  %s4069_s15 = smov %s3006_s16 }
 0x242   : > { %p11_p5 = scmp.ge.s32.totalorder %s14_s17, 4   ;;  %s4070_s16 = smov %s4072_s18 }
 0x244   :  { %13 = sbr.rel (!%p11_p5) target bundleno = 2 (0x2), region = 78 }

</bundles_post_ra>
